<compile_context>
chip_gen: v7x
topology: tpu7x:2x2x1
jax: 0.10.0
libtpu: 0.0.40
codegen_flags: <defaults>
</compile_context>

<pallas_src>
import functools
import math

import jax
import jax.numpy as jnp
from jax import lax
from jax.experimental import pallas as pl
from jax.experimental.pallas import tpu as pltpu

LN_EPS = 1e-5  # matches torch.nn.LayerNorm default


def _msa_transition_kernel(m_ref, w1_ref, b1_ref, w2_ref, b2_ref, o_ref, *,
                           hidden_chunk):
    # m_ref: (row_tile, c_m) tile of rows; w1/w2 are bf16, b1/b2 are f32.
    x = m_ref[...].astype(jnp.float32)

    # LayerNorm over the channel (last) dim, biased variance like PyTorch.
    mu = jnp.mean(x, axis=-1, keepdims=True)
    xc = x - mu
    var = jnp.mean(xc * xc, axis=-1, keepdims=True)
    # gamma/beta are already folded into w1/b1 by the wrapper; cast the
    # normalized activations to bf16 so both dots use the MXU bf16 path.
    xn = (xc * lax.rsqrt(var + LN_EPS)).astype(jnp.bfloat16)

    hidden = w1_ref.shape[1]
    num_chunks = hidden // hidden_chunk

    # Static (unrolled at trace time) chunking of the hidden dim bounds the
    # live (row_tile, hidden) f32 intermediate for large c_m.  The accumulator
    # is initialized from the first chunk (no zeros+add) and is elided when
    # there is a single chunk.
    out = None
    for ci in range(num_chunks):
        h0 = ci * hidden_chunk
        a = jnp.dot(xn, w1_ref[:, h0:h0 + hidden_chunk],
                    preferred_element_type=jnp.float32)
        a = jnp.maximum(a + b1_ref[:, h0:h0 + hidden_chunk], 0.0)
        partial = jnp.dot(a.astype(jnp.bfloat16),
                          w2_ref[h0:h0 + hidden_chunk, :],
                          preferred_element_type=jnp.float32)
        out = partial if out is None else out + partial

    o_ref[...] = (out + b2_ref[...]).astype(o_ref.dtype)


def _resident_spec(shape):
    """BlockSpec for an operand whose index map is constant across the grid:
    fetched once, kept resident, single-buffered (no pointless dbl-buffer)."""
    index_map = lambda i: (0,) * len(shape)
    try:
        return pl.BlockSpec(shape, index_map, pipeline_mode=pl.Buffered(1))
    except Exception:  # older jax without pipeline_mode on BlockSpec
        return pl.BlockSpec(shape, index_map)


def fold_msa_transition_params(gamma, beta, w1, b1, w2, b2):
    """Fold the LayerNorm affine into linear_1 (exact in f32) and cast weights
    to bf16.  Call ONCE outside the hot path and cache the result.

    Weights are stored as (in, out), i.e. y = x @ W + b.
    """
    gamma_f = gamma.astype(jnp.float32)
    beta_f = beta.astype(jnp.float32)
    w1_f = w1.astype(jnp.float32)
    hidden = w1_f.shape[1]
    c_m = w2.shape[1]

    w1_fold = (gamma_f[:, None] * w1_f).astype(jnp.bfloat16)       # (c_m, hidden)
    b1_fold = (beta_f @ w1_f + b1.astype(jnp.float32)).reshape(1, hidden)
    w2_bf = w2.astype(jnp.bfloat16)                                # (hidden, c_m)
    b2_f = b2.astype(jnp.float32).reshape(1, c_m)
    return w1_fold, b1_fold, w2_bf, b2_f


def msa_transition_prepared(m, folded_params, *, row_tile=1024):
    """Hot-path entry: m is (..., c_m); folded_params from
    fold_msa_transition_params()."""
    w1_bf, b1_2, w2_bf, b2_2 = folded_params
    c_m = m.shape[-1]
    hidden = w1_bf.shape[-1]
    lead_shape = m.shape[:-1]
    rows = math.prod(lead_shape) if lead_shape else 1

    # ---- Row tiling: no padding, no output slice.  Partial last block is
    # handled by Pallas (reads of the OOB tail are unspecified, stores masked).
    row_tile = max(8, (row_tile // 8) * 8)
    if rows >= 16:
        # Cap so the parallel grid has >= 2 steps (v7x has 2 TensorCores).
        half = ((-(-rows // 2)) + 7) // 8 * 8
        row_tile = min(row_tile, half)
    else:
        row_tile = rows  # single full-extent block
    grid = (pl.cdiv(rows, row_tile),)

    m2 = m.reshape(rows, c_m)

    # Hidden-dim chunk: only split when the f32 intermediate would get large.
    if hidden > 1024 and hidden % 1024 == 0:
        hidden_chunk = 1024
    elif hidden > 1024 and hidden % 512 == 0:
        hidden_chunk = 512
    else:
        hidden_chunk = hidden

    # ---- VMEM budget (dbl-buffered I/O tiles + single-buffered weights + temps).
    in_bytes = m2.dtype.itemsize
    out_bytes = jnp.dtype(m.dtype).itemsize
    vmem_need = (
        2 * row_tile * c_m * in_bytes          # input tiles (double-buffered)
        + 2 * row_tile * c_m * out_bytes       # output tiles (double-buffered)
        + 2 * (c_m * hidden + hidden * c_m)    # bf16 weights (single-buffered)
        + (hidden + c_m) * 4                   # f32 biases
        + row_tile * c_m * (4 + 2)             # x (f32) + xn (bf16)
        + row_tile * hidden_chunk * (4 + 2)    # first-dot chunk (f32 + bf16 copy)
        + row_tile * c_m * 4                   # f32 accumulator / pre-store value
    )
    try:
        hw_vmem = pltpu.get_tpu_info().vmem_capacity_bytes
    except Exception:
        hw_vmem = 128 << 20
    vmem_limit = int(min(max(2 * vmem_need + (2 << 20), 16 << 20), hw_vmem // 2))

    # Advisory cost estimate so XLA can schedule around the custom call.
    flops = 4 * rows * c_m * hidden + 10 * rows * c_m
    bytes_accessed = (rows * c_m * (in_bytes + out_bytes)
                      + 2 * (c_m * hidden + hidden * c_m) + (hidden + c_m) * 4)
    cost = pl.CostEstimate(flops=int(flops), transcendentals=int(rows),
                           bytes_accessed=int(bytes_accessed))

    kernel = functools.partial(_msa_transition_kernel, hidden_chunk=hidden_chunk)

    out = pl.pallas_call(
        kernel,
        out_shape=jax.ShapeDtypeStruct((rows, c_m), m.dtype),
        grid_spec=pltpu.PrefetchScalarGridSpec(
            num_scalar_prefetch=0,
            grid=grid,
            in_specs=[
                pl.BlockSpec((row_tile, c_m), lambda i: (i, 0)),  # m rows
                _resident_spec((c_m, hidden)),                    # w1 (bf16)
                _resident_spec((1, hidden)),                      # b1 (f32)
                _resident_spec((hidden, c_m)),                    # w2 (bf16)
                _resident_spec((1, c_m)),                         # b2 (f32)
            ],
            out_specs=pl.BlockSpec((row_tile, c_m), lambda i: (i, 0)),
        ),
        compiler_params=pltpu.CompilerParams(
            dimension_semantics=("parallel",),
            vmem_limit_bytes=vmem_limit),
        cost_estimate=cost,
    )(m2, w1_bf, b1_2, w2_bf, b2_2)

    return out.reshape(*lead_shape, c_m)


def msa_transition(m, gamma, beta, w1, b1, w2, b2, *, row_tile=1024):
    """Convenience wrapper: folds parameters on every call (prefer caching
    fold_msa_transition_params() output and calling msa_transition_prepared)."""
    folded = fold_msa_transition_params(gamma, beta, w1, b1, w2, b2)
    return msa_transition_prepared(m, folded, row_tile=row_tile)


# ---------------- references ----------------

def _reference_f32(m, gamma, beta, w1, b1, w2, b2):
    """Pure f32 module semantics (LayerNorm -> Linear -> ReLU -> Linear)."""
    x = m.astype(jnp.float32)
    mu = jnp.mean(x, axis=-1, keepdims=True)
    var = jnp.mean((x - mu) ** 2, axis=-1, keepdims=True)
    xn = (x - mu) * lax.rsqrt(var + LN_EPS) * gamma + beta
    a = jnp.maximum(xn @ w1 + b1, 0.0)
    return a @ w2 + b2  # f32


def _reference_kernel_numerics(m, gamma, beta, w1, b1, w2, b2):
    """Replicates the kernel's folding + bf16 MXU operands (f32 accumulate)."""
    w1f = gamma[:, None] * w1
    b1f = beta @ w1 + b1
    w1_bf = w1f.astype(jnp.bfloat16)
    w2_bf = w2.astype(jnp.bfloat16)
    x = m.astype(jnp.float32)
    mu = jnp.mean(x, axis=-1, keepdims=True)
    xc = x - mu
    var = jnp.mean(xc * xc, axis=-1, keepdims=True)
    xn = (xc * lax.rsqrt(var + LN_EPS)).astype(jnp.bfloat16)
    a = jnp.dot(xn, w1_bf, preferred_element_type=jnp.float32) + b1f
    a = jnp.maximum(a, 0.0).astype(jnp.bfloat16)
    out = jnp.dot(a, w2_bf, preferred_element_type=jnp.float32) + b2
    return out.astype(m.dtype)


if __name__ == "__main__":
    # Module config: c_m channels (lane-dense), expansion n=4.
    c_m = 128
    n_expand = 4
    hidden = n_expand * c_m

    # MSA tensor (batch, n_seq, n_res, c_m): rows = 2*7*47 = 658, which is NOT
    # a multiple of the row tile -> exercises the masked partial last block
    # (no wrapper pad/slice) and still gives a 2-step parallel grid.
    batch, n_seq, n_res = 2, 7, 47

    key = jax.random.PRNGKey(0)
    k_m, k_g, k_b, k_w1, k_b1, k_w2, k_b2 = jax.random.split(key, 7)

    # bf16 activation I/O (review: halves HBM traffic on this HBM-bound shape).
    m = jax.random.normal(k_m, (batch, n_seq, n_res, c_m),
                          dtype=jnp.float32).astype(jnp.bfloat16)

    # Deterministic synthetic parameters (non-trivial gamma/beta to test folding).
    gamma = 1.0 + 0.1 * jax.random.normal(k_g, (c_m,), dtype=jnp.float32)
    beta = 0.05 * jax.random.normal(k_b, (c_m,), dtype=jnp.float32)
    # Stored as (in, out) = transpose of PyTorch's (out, in) weight layout.
    w1 = jax.random.normal(k_w1, (c_m, hidden), dtype=jnp.float32) * (1.0 / c_m ** 0.5)
    b1 = 0.02 * jax.random.normal(k_b1, (hidden,), dtype=jnp.float32)
    w2 = jax.random.normal(k_w2, (hidden, c_m), dtype=jnp.float32) * (1.0 / hidden ** 0.5)
    b2 = 0.02 * jax.random.normal(k_b2, (c_m,), dtype=jnp.float32)

    # Fold gamma/beta into linear_1 ONCE, outside the hot path, then jit the
    # prepared forward.
    folded = fold_msa_transition_params(gamma, beta, w1, b1, w2, b2)
    folded = jax.tree_util.tree_map(jax.block_until_ready, folded)

    fwd = jax.jit(msa_transition_prepared)
    out = jax.block_until_ready(fwd(m, folded))
    assert out.shape == m.shape and out.dtype == m.dtype

    out_f = out.astype(jnp.float32)

    # Tight check against a reference with identical numerics (bf16 operands).
    ref_exact = _reference_kernel_numerics(m, gamma, beta, w1, b1, w2, b2)
    err_exact = float(jnp.max(jnp.abs(out_f - ref_exact.astype(jnp.float32))))
    assert err_exact < 5e-2, f"kernel-numerics mismatch: {err_exact}"

    # Looser sanity check against pure-f32 module semantics (bf16 MXU path +
    # bf16 output rounding are deliberate deviations from the fp32 module).
    ref_f32 = _reference_f32(m, gamma, beta, w1, b1, w2, b2)
    err_f32 = float(jnp.max(jnp.abs(out_f - ref_f32)))
    assert err_f32 < 1.5e-1, f"module-semantics mismatch: {err_f32}"

    print("KERNEL_OK")
</pallas_src>

<mosaic_0001>
module attributes {stable_mosaic.version = 11 : i64} {
  func.func @_msa_transition_kernel(%arg0: i32, %arg1: memref<336x128xbf16, #tpu.memory_space<vmem>>, %arg2: memref<128x512xbf16, #tpu.memory_space<vmem>>, %arg3: memref<1x512xf32, #tpu.memory_space<vmem>>, %arg4: memref<512x128xbf16, #tpu.memory_space<vmem>>, %arg5: memref<1x128xf32, #tpu.memory_space<vmem>>, %arg6: memref<336x128xbf16, #tpu.memory_space<vmem>>) attributes {dimension_semantics = [#tpu.dimension_semantics<parallel>], iteration_bounds = array<i64: 2>, scalar_prefetch = 0 : i64, scratch_operands = 0 : i64, tpu.core_type = #tpu.core_type<tc>, window_params = [{transform_indices = @transform_0, window_bounds = array<i64: 336, 128>}, {pipeline_mode = #tpu.pipeline_mode<synchronous>, transform_indices = @transform_1, window_bounds = array<i64: 128, 512>}, {pipeline_mode = #tpu.pipeline_mode<synchronous>, transform_indices = @transform_2, window_bounds = array<i64: 1, 512>}, {pipeline_mode = #tpu.pipeline_mode<synchronous>, transform_indices = @transform_3, window_bounds = array<i64: 512, 128>}, {pipeline_mode = #tpu.pipeline_mode<synchronous>, transform_indices = @transform_4, window_bounds = array<i64: 1, 128>}, {transform_indices = @transform_5, window_bounds = array<i64: 336, 128>}]} {
    %c0 = arith.constant 0 : index
    %c0_0 = arith.constant 0 : index
    %0 = vector.load %arg1[%c0, %c0_0] : memref<336x128xbf16, #tpu.memory_space<vmem>>, vector<336x128xbf16>
    %1 = arith.extf %0 : vector<336x128xbf16> to vector<336x128xf32>
    %cst = arith.constant dense<0.000000e+00> : vector<336xf32>
    %2 = vector.multi_reduction <add>, %1, %cst [1] : vector<336x128xf32> to vector<336xf32>
    %3 = vector.shape_cast %2 : vector<336xf32> to vector<336x1xf32>
    %cst_1 = arith.constant 1.280000e+02 : f32
    %4 = vector.broadcast %cst_1 : f32 to vector<336x1xf32>
    %5 = arith.divf %3, %4 : vector<336x1xf32>
    %6 = vector.broadcast %5 : vector<336x1xf32> to vector<336x128xf32>
    %7 = arith.subf %1, %6 : vector<336x128xf32>
    %8 = arith.mulf %7, %7 : vector<336x128xf32>
    %cst_2 = arith.constant dense<0.000000e+00> : vector<336xf32>
    %9 = vector.multi_reduction <add>, %8, %cst_2 [1] : vector<336x128xf32> to vector<336xf32>
    %10 = vector.shape_cast %9 : vector<336xf32> to vector<336x1xf32>
    %cst_3 = arith.constant 1.280000e+02 : f32
    %11 = vector.broadcast %cst_3 : f32 to vector<336x1xf32>
    %12 = arith.divf %10, %11 : vector<336x1xf32>
    %cst_4 = arith.constant 9.99999974E-6 : f32
    %13 = vector.broadcast %cst_4 : f32 to vector<336x1xf32>
    %14 = arith.addf %12, %13 : vector<336x1xf32>
    %15 = math.rsqrt %14 : vector<336x1xf32>
    %16 = vector.broadcast %15 : vector<336x1xf32> to vector<336x128xf32>
    %17 = arith.mulf %7, %16 : vector<336x128xf32>
    %18 = arith.truncf %17 : vector<336x128xf32> to vector<336x128xbf16>
    %c0_5 = arith.constant 0 : index
    %c0_6 = arith.constant 0 : index
    %19 = vector.load %arg2[%c0_5, %c0_6] : memref<128x512xbf16, #tpu.memory_space<vmem>>, vector<128x512xbf16>
    %cst_7 = arith.constant dense<0.000000e+00> : vector<336x512xf32>
    %20 = tpu.matmul %18, %19, %cst_7 {dimension_numbers = #tpu.dot_dimension_numbers<[1], [0], [0], [1], [0, 0, 1, 1], [], []>} : vector<336x128xbf16>, vector<128x512xbf16>, vector<336x512xf32> -> vector<336x512xf32>
    %c0_8 = arith.constant 0 : index
    %c0_9 = arith.constant 0 : index
    %21 = vector.load %arg3[%c0_8, %c0_9] : memref<1x512xf32, #tpu.memory_space<vmem>>, vector<1x512xf32>
    %22 = vector.broadcast %21 : vector<1x512xf32> to vector<336x512xf32>
    %23 = arith.addf %20, %22 : vector<336x512xf32>
    %cst_10 = arith.constant 0.000000e+00 : f32
    %24 = vector.broadcast %cst_10 : f32 to vector<336x512xf32>
    %25 = arith.maximumf %23, %24 : vector<336x512xf32>
    %26 = arith.truncf %25 : vector<336x512xf32> to vector<336x512xbf16>
    %c0_11 = arith.constant 0 : index
    %c0_12 = arith.constant 0 : index
    %27 = vector.load %arg4[%c0_11, %c0_12] : memref<512x128xbf16, #tpu.memory_space<vmem>>, vector<512x128xbf16>
    %cst_13 = arith.constant dense<0.000000e+00> : vector<336x128xf32>
    %28 = tpu.matmul %26, %27, %cst_13 {dimension_numbers = #tpu.dot_dimension_numbers<[1], [0], [0], [1], [0, 0, 1, 1], [], []>} : vector<336x512xbf16>, vector<512x128xbf16>, vector<336x128xf32> -> vector<336x128xf32>
    %c0_14 = arith.constant 0 : index
    %c0_15 = arith.constant 0 : index
    %29 = vector.load %arg5[%c0_14, %c0_15] : memref<1x128xf32, #tpu.memory_space<vmem>>, vector<1x128xf32>
    %30 = vector.broadcast %29 : vector<1x128xf32> to vector<336x128xf32>
    %31 = arith.addf %28, %30 : vector<336x128xf32>
    %32 = arith.truncf %31 : vector<336x128xf32> to vector<336x128xbf16>
    %c0_16 = arith.constant 0 : index
    %c0_17 = arith.constant 0 : index
    %33 = vector.load %arg6[%c0_16, %c0_17] : memref<336x128xbf16, #tpu.memory_space<vmem>>, vector<336x128xbf16>
    tpu.vector_store %arg6[%c0_16, %c0_17], %32 {strides = array<i32>} : memref<336x128xbf16, #tpu.memory_space<vmem>>, vector<336x128xbf16>,
    return
  }
  func.func @transform_0(%arg0: i32) -> (i32, i32) {
    %c0_i32 = arith.constant 0 : i32
    %c0_i32_0 = arith.constant 0 : i32
    return %arg0, %c0_i32 : i32, i32
  }
  func.func @transform_1(%arg0: i32) -> (i32, i32) {
    %c0_i32 = arith.constant 0 : i32
    %c0_i32_0 = arith.constant 0 : i32
    %c0_i32_1 = arith.constant 0 : i32
    return %c0_i32, %c0_i32_0 : i32, i32
  }
  func.func @transform_2(%arg0: i32) -> (i32, i32) {
    %c0_i32 = arith.constant 0 : i32
    %c0_i32_0 = arith.constant 0 : i32
    %c0_i32_1 = arith.constant 0 : i32
    return %c0_i32, %c0_i32_0 : i32, i32
  }
  func.func @transform_3(%arg0: i32) -> (i32, i32) {
    %c0_i32 = arith.constant 0 : i32
    %c0_i32_0 = arith.constant 0 : i32
    %c0_i32_1 = arith.constant 0 : i32
    return %c0_i32, %c0_i32_0 : i32, i32
  }
  func.func @transform_4(%arg0: i32) -> (i32, i32) {
    %c0_i32 = arith.constant 0 : i32
    %c0_i32_0 = arith.constant 0 : i32
    %c0_i32_1 = arith.constant 0 : i32
    return %c0_i32, %c0_i32_0 : i32, i32
  }
  func.func @transform_5(%arg0: i32) -> (i32, i32) {
    %c0_i32 = arith.constant 0 : i32
    %c0_i32_0 = arith.constant 0 : i32
    return %arg0, %c0_i32 : i32, i32
  }
}

</mosaic_0001>

<bundles_post_ra>
// kernel: msa_transition_prepared.1
= control target key start
LH: loop header
LB: loop body
LE: loop exit
PB: predicated region body
PF: predicated region fallthrough
CT: control target
= control target key end

     0   :  { %s3880_s18 = smov 0   ;;  %s3882_s19 = smov 0   ;;  %s5236_s0 = inlined_call_operand.vmem [shape: bf16[658,128], index: 0, kind: input, shape index: {}]   ;;  %s5237_s1 = inlined_call_operand.vmem [shape: bf16[128,512], index: 1, kind: input, shape index: {}]   ;;  %s5238_s2 = inlined_call_operand.vmem [shape: f32[1,512], index: 2, kind: input, shape index: {}]   ;;  %s5239_s3 = inlined_call_operand.vmem [shape: bf16[512,128], index: 3, kind: input, shape index: {}]   ;;  %s5240_s4 = inlined_call_operand.vmem [shape: f32[1,128], index: 4, kind: input, shape index: {}]   ;;  %s5241_s5 = inlined_call_operand.vmem [shape: bf16[658,128], index: 5, kind: output, shape index: {}]  }
   0x1   :  { %s3884_s20 = smov 0  }
   0x2 LB: > { %s3893_s21 = sadd.s32 4294967295, %s3815_s20   ;;  %s3895_s22 = sadd.s32 1, %s3815_s20   ;;  %s3815_s20 = sphi %s3884_s20, %s5258_s20   ;;  %s3811_s19 = sphi %s3882_s19, %s5257_s19   ;;  %s3807_s18 = sphi %s3880_s18, %s5256_s18  }
   0x3   : > { %s129_s23 = ssub.s32 %s3815_s20, %s3895_s22  ;;  %s132_s24 = sadd.s32 1, %s3811_s19 }
   0x4   : > { %p130_p0 = scmp.eq.s32.totalorder %s129_s23, 0  ;;  %p142_p1 = scmp.ne.s32.totalorder %s3811_s19, %s3807_s18 }
   0x5   : > { %p143_p2 = scmp.eq.s32.totalorder %s3893_s21, 1  ;;  %p3025_p3 = scmp.ge.s32.totalorder %s3815_s20, 1 }
   0x6   : > { %s3903_s25 = scalar_select %p130_p0, %s3811_s19, %s132_s24  }
   0x7   : > { %p3905_p4 = por %p143_p2, %p142_p1  ;;  %p196_p5 = scmp.lt.s32.totalorder %s3815_s20, 3 }
   0x9   : > { %p197_p6 = pnand %p3025_p3, %p196_p5 }
   0xb   : > { %200 = sbr.rel (%p197_p6) target bundleno = 1178 (0x49a), region = 40 }
  0x12   : > { %s3910_s27 = smul.u32 42, %s3893_s21  ;;  %v3593_v30 = vld [vmem:[%s5237_s1 + $0x4] ss:$16 sps:$4 sm:$0xff]   ;;  %v3595_v31 = vld [vmem:[%s5237_s1 + $0xc] ss:$16 sps:$4 sm:$0xff]   ;;  %s224_s17 = sand.u32 1, %s3807_s18  }
  0x13   : > { %v3597_v32 = vld [vmem:[%s5237_s1] ss:$16 sps:$4 sm:$0xff]   ;;  %v3598_v33 = vld [vmem:[%s5237_s1 + $0x8] ss:$16 sps:$4 sm:$0xff]   ;;  %v3599_v34 = vld [vmem:[%s5237_s1 + $0x24] ss:$16 sps:$4 sm:$0xff]   ;;  %1029 = vmatprep.subr.bf16.mxu0 %v3593_v30  ;;  %1272 = vmatprep.subr.bf16.mxu1 %v3595_v31 }
  0x14   : > { %p232_p7 = scmp.lt.s32.totalorder %s3910_s27, 82  ;;  %v3601_v35 = vld [vmem:[%s5237_s1 + $0x2c] ss:$16 sps:$4 sm:$0xff]   ;;  %1030 = vmatpush1.bf16.msra.mxu0 %v3597_v32  ;;  %1273 = vmatpush1.bf16.msra.mxu1 %v3598_v33  ;;  %v3603_v36 = vld [vmem:[%s5237_s1 + $0x20] ss:$16 sps:$4 sm:$0xff]   ;;  %s3502_s20 = smul.u32 168, %s224_s17 }
  0x15   : > { %v3604_v37 = vld [vmem:[%s5237_s1 + $0x28] ss:$16 sps:$4 sm:$0xff]   ;;  %1031 = vmatprep.subr.bf16.mxu0 %v3599_v34  ;;  %1274 = vmatprep.subr.bf16.mxu1 %v3601_v35  ;;  %v3605_v38 = vld [vmem:[%s5237_s1 + $0x44] ss:$16 sps:$4 sm:$0xff]   ;;  %v3607_v39 = vld [vmem:[%s5237_s1 + $0x4c] ss:$16 sps:$4 sm:$0xff]  }
  0x16   : > { %s233_s28 = scalar_select %p232_p7, %s3910_s27, 82  ;;  %v3609_v30 = vld [vmem:[%s5237_s1 + $0x40] ss:$16 sps:$4 sm:$0xff]   ;;  %v3610_v31 = vld [vmem:[%s5237_s1 + $0x48] ss:$16 sps:$4 sm:$0xff]  }
  0x17   : > { %s5023_s18 = scalar_lea.vmem [#allocation2], %s3502_s20   ;;  %s2650_s23 = ssub.s32 (%p3905_p4), 83, %s3910_s27 }
  0x18   : > { %s3026_s29 = sshll.u32 %s233_s28, 2  ;;  %1032 = vmatpush1.bf16.msra.mxu0 %v3603_v36  ;;  %1275 = vmatpush1.bf16.msra.mxu1 %v3604_v37  ;;  %s3188_s24 = smul.u32 (%p3905_p4), 168, %s3893_s21 }
  0x19   : > { %s3917_s7 = scalar_lea.vmem %s5236_s0, %s3026_s29  ;;  %1033 = vmatprep.subr.bf16.mxu0 %v3605_v38  ;;  %1276 = vmatprep.subr.bf16.mxu1 %v3607_v39  ;;  %v3615_v38 = vld [vmem:[%s5237_s1 + $0x60] ss:$16 sps:$4 sm:$0xff]   ;;  %v3616_v39 = vld [vmem:[%s5237_s1 + $0x68] ss:$16 sps:$4 sm:$0xff]   ;;  %p2651_p8 = scmp.lt.s32.totalorder (%p3905_p4), %s2650_s23, 42 }
  0x1a   : > { %v3920_v0 = vld [vmem:[%s3917_s7] sm:$0xff]   ;;  %v3923_v1 = vld [vmem:[%s3917_s7 + $0x8] sm:$0xff]   ;;  %v3934_v6 = vld [vmem:[%s3917_s7 + $0x10] sm:$0xff]   ;;  %s5093_s29 = scalar_lea.vmem (%p3905_p4), %s5241_s5, %s3188_s24  }
  0x1b   : > { %v3191_v2 = vunpack.c.l.bf16 %v3920_v0  ;;  %v3195_v3 = vunpack.c.l.bf16 %v3923_v1  ;;  %v3192_v4 = vunpack.c.h.bf16 %v3920_v0  ;;  %v3196_v5 = vunpack.c.h.bf16 %v3923_v1  ;;  %v3937_v7 = vld [vmem:[%s3917_s7 + $0x18] sm:$0xff]   ;;  %v3946_v10 = vld [vmem:[%s3917_s7 + $0x20] sm:$0xff]   ;;  %v3955_v13 = vld [vmem:[%s3917_s7 + $0x28] sm:$0xff]  }
  0x1c   : > { %v3199_v8 = vunpack.c.l.bf16 %v3934_v6  ;;  %v3200_v9 = vunpack.c.h.bf16 %v3934_v6  ;;  %v3203_v11 = vunpack.c.l.bf16 %v3937_v7  ;;  %v3204_v12 = vunpack.c.h.bf16 %v3937_v7  ;;  %v3964_v16 = vld [vmem:[%s3917_s7 + $0x30] sm:$0xff]   ;;  %v3979_v21 = vld [vmem:[%s3917_s7 + $0x38] sm:$0xff]   ;;  %v3988_v24 = vld [vmem:[%s3917_s7 + $0x40] sm:$0xff]   ;;  %1034 = vmatpush1.bf16.msra.mxu0 %v3609_v30  ;;  %1277 = vmatpush1.bf16.msra.mxu1 %v3610_v31 }
  0x1d   : > { %331 = vadd.xlane.f32.xlu0 %v3191_v2  ;;  %335 = vadd.xlane.f32.xlu1 %v3195_v3  ;;  %v3207_v14 = vunpack.c.l.bf16 %v3946_v10  ;;  %v3208_v15 = vunpack.c.h.bf16 %v3946_v10  ;;  %v3211_v17 = vunpack.c.l.bf16 %v3955_v13  ;;  %v3212_v18 = vunpack.c.h.bf16 %v3955_v13  ;;  %v3997_v27 = vld [vmem:[%s3917_s7 + $0x48] sm:$0xff]   ;;  %v4044_v46 = vld [vmem:[%s3917_s7 + $0x50] sm:$0xff]   ;;  %v4069_v60 = vld [vmem:[%s3917_s7 + $0x58] sm:$0xff]  }
  0x1e   : > { %v3215_v19 = vunpack.c.l.bf16 %v3964_v16  ;;  %v3216_v20 = vunpack.c.h.bf16 %v3964_v16  ;;  %v3219_v22 = vunpack.c.l.bf16 %v3979_v21  ;;  %v3220_v23 = vunpack.c.h.bf16 %v3979_v21  ;;  %v4096_v32 = vld [vmem:[%s3917_s7 + $0x60] sm:$0xff]  }
  0x1f   : > { %v3223_v25 = vunpack.c.l.bf16 %v3988_v24  ;;  %v3224_v26 = vunpack.c.h.bf16 %v3988_v24  ;;  %v3227_v28 = vunpack.c.l.bf16 %v3997_v27  ;;  %v3228_v29 = vunpack.c.h.bf16 %v3997_v27  ;;  %v3611_v6 = vld [vmem:[%s5237_s1 + $0x64] ss:$16 sps:$4 sm:$0xff]  }
  0x20   : > { %v3231_v52 = vunpack.c.l.bf16 %v4044_v46  ;;  %v3232_v58 = vunpack.c.h.bf16 %v4044_v46  ;;  %v3235_v63 = vunpack.c.l.bf16 %v4069_v60  ;;  %v3239_v36 = vunpack.c.l.bf16 %v4096_v32  ;;  %1035 = vmatprep.subr.bf16.mxu0 %v3611_v6  ;;  %v3623_v7 = vld [vmem:[%s5237_s1 + $0xa4] ss:$16 sps:$4 sm:$0xff]   ;;  %v3633_v6 = vld [vmem:[%s5237_s1 + $0xc0] ss:$16 sps:$4 sm:$0xff]  }
  0x21   : > { %333 = vadd.xlane.f32.xlu0 %v3192_v4  ;;  %337 = vadd.xlane.f32.xlu1 %v3196_v5  ;;  %v3635_v10 = vld [vmem:[%s5237_s1 + $0xe4] ss:$16 sps:$4 sm:$0xff]  }
  0x22   : > { %1036 = vmatpush1.bf16.msra.mxu0 %v3615_v38 }
  0x25   : > { %339 = vadd.xlane.f32.xlu0 %v3199_v8  ;;  %341 = vadd.xlane.f32.xlu1 %v3200_v9 }
  0x29   : > { %343 = vadd.xlane.f32.xlu0 %v3203_v11  ;;  %345 = vadd.xlane.f32.xlu1 %v3204_v12 }
  0x2d   : > { %347 = vadd.xlane.f32.xlu0 %v3207_v14  ;;  %349 = vadd.xlane.f32.xlu1 %v3208_v15 }
  0x31   : > { %351 = vadd.xlane.f32.xlu0 %v3211_v17  ;;  %353 = vadd.xlane.f32.xlu1 %v3212_v18 }
  0x35   : > { %355 = vadd.xlane.f32.xlu0 %v3215_v19  ;;  %357 = vadd.xlane.f32.xlu1 %v3216_v20 }
  0x39   : > { %359 = vadd.xlane.f32.xlu0 %v3219_v22  ;;  %361 = vadd.xlane.f32.xlu1 %v3220_v23 }
  0x3d   : > { %363 = vadd.xlane.f32.xlu0 %v3223_v25  ;;  %365 = vadd.xlane.f32.xlu1 %v3224_v26 }
  0x41   : > { %367 = vadd.xlane.f32.xlu0 %v3227_v28  ;;  %369 = vadd.xlane.f32.xlu1 %v3228_v29 }
  0xaa   : > { %v332_v40 = vpop.xlane.xlu0 %331  ;;  %v336_v41 = vpop.xlane.xlu1 %335 }
  0xab   : > { %v416_v42 = vmul.f32 0.0078125, %v332_v40  ;;  %v418_v44 = vmul.f32 0.0078125, %v336_v41  ;;  %v3619_v41 = vld [vmem:[%s5237_s1 + $0x8c] ss:$16 sps:$4 sm:$0xff]  }
  0xad   : > { %v4041_v43 = vsub.f32 %v3191_v2, %v416_v42  ;;  %v4054_v51 = vsub.f32 %v3195_v3, %v418_v44  ;;  %v3240_v44 = vunpack.c.h.bf16 %v4096_v32 }
  0xae   : > { %v334_v45 = vpop.xlane.xlu0 %333  ;;  %v338_v47 = vpop.xlane.xlu1 %337 }
  0xaf   : > { %v417_v48 = vmul.f32 0.0078125, %v334_v45  ;;  %v500_v49 = vmul.f32 %v4041_v43, %v4041_v43  ;;  %v419_v53 = vmul.f32 0.0078125, %v338_v47  ;;  %v502_v57 = vmul.f32 %v4054_v51, %v4054_v51 }
  0xb1   : > { %v4050_v50 = vsub.f32 %v3192_v4, %v417_v48  ;;  %542 = vadd.xlane.f32.xlu0 %v500_v49  ;;  %v4063_v56 = vsub.f32 %v3196_v5, %v419_v53  ;;  %v3236_v4 = vunpack.c.h.bf16 %v4069_v60  ;;  %v3621_v48 = vld [vmem:[%s5237_s1 + $0x80] ss:$16 sps:$4 sm:$0xff]   ;;  %v3622_v49 = vld [vmem:[%s5237_s1 + $0x88] ss:$16 sps:$4 sm:$0xff]  }
  0xb2   : > { %v340_v54 = vpop.xlane.xlu0 %339  ;;  %v342_v61 = vpop.xlane.xlu1 %341  ;;  %v4141_v53 = vld [vmem:[%s3917_s7 + $0x68] sm:$0xff]  }
  0xb3   : > { %v501_v55 = vmul.f32 %v4050_v50, %v4050_v50  ;;  %v420_v59 = vmul.f32 0.0078125, %v340_v54  ;;  %v503_v0 = vmul.f32 %v4063_v56, %v4063_v56  ;;  %v421_v1 = vmul.f32 0.0078125, %v342_v61 }
  0xb4   : > { %v3244_v30 = vunpack.c.h.bf16 %v4141_v53 }
  0xb5   : > { %371 = vadd.xlane.f32.xlu0 %v3231_v52  ;;  %544 = vadd.xlane.f32.xlu1 %v501_v55  ;;  %v4075_v62 = vsub.f32 %v3199_v8, %v420_v59  ;;  %v4084_v3 = vsub.f32 %v3200_v9, %v421_v1  ;;  %v3613_v9 = vld [vmem:[%s5237_s1 + $0x6c] ss:$16 sps:$4 sm:$0xff]   ;;  %v3243_v59 = vunpack.c.l.bf16 %v4141_v53  ;;  %v3628_v1 = vld [vmem:[%s5237_s1 + $0xa8] ss:$16 sps:$4 sm:$0xff]  }
  0xb6   : > { %v344_v2 = vpop.xlane.xlu0 %343  ;;  %v346_v33 = vpop.xlane.xlu1 %345  ;;  %1278 = vmatprep.subr.bf16.mxu1 %v3613_v9  ;;  %v3634_v9 = vld [vmem:[%s5237_s1 + $0xc8] ss:$16 sps:$4 sm:$0xff]  }
  0xb7   : > { %v504_v5 = vmul.f32 %v4075_v62, %v4075_v62  ;;  %v422_v8 = vmul.f32 0.0078125, %v344_v2  ;;  %v505_v35 = vmul.f32 %v4084_v3, %v4084_v3  ;;  %v423_v37 = vmul.f32 0.0078125, %v346_v33  ;;  %1279 = vmatpush1.bf16.msra.mxu1 %v3616_v39 }
  0xb8   : > { %1280 = vmatprep.subr.bf16.mxu1 %v3619_v41  ;;  %v3639_v41 = vld [vmem:[%s5237_s1 + $0xe0] ss:$16 sps:$4 sm:$0xff]  }
  0xb9   : > { %546 = vadd.xlane.f32.xlu0 %v502_v57  ;;  %373 = vadd.xlane.f32.xlu1 %v3232_v58  ;;  %v4108_v34 = vsub.f32 %v3203_v11, %v422_v8  ;;  %v3617_v11 = vld [vmem:[%s5237_s1 + $0x84] ss:$16 sps:$4 sm:$0xff]   ;;  %v4129_v42 = vsub.f32 %v3204_v12, %v423_v37  ;;  %v3625_v12 = vld [vmem:[%s5237_s1 + $0xac] ss:$16 sps:$4 sm:$0xff]  }
  0xba   : > { %v348_v40 = vpop.xlane.xlu0 %347  ;;  %v350_v54 = vpop.xlane.xlu1 %349  ;;  %1037 = vmatprep.subr.bf16.mxu0 %v3617_v11 }
  0xbb   : > { %v506_v45 = vmul.f32 %v4108_v34, %v4108_v34  ;;  %v424_v47 = vmul.f32 0.0078125, %v348_v40  ;;  %1038 = vmatpush1.bf16.msra.mxu0 %v3621_v48  ;;  %1281 = vmatpush1.bf16.msra.mxu1 %v3622_v49  ;;  %v507_v57 = vmul.f32 %v4129_v42, %v4129_v42  ;;  %v425_v61 = vmul.f32 0.0078125, %v350_v54 }
  0xbc   : > { %1039 = vmatprep.subr.bf16.mxu0 %v3623_v7  ;;  %1282 = vmatprep.subr.bf16.mxu1 %v3625_v12  ;;  %v4219_v7 = vld [vmem:[%s3917_s7 + $0x78] sm:$0xff]  }
  0xbd   : > { %375 = vadd.xlane.f32.xlu0 %v3235_v63  ;;  %548 = vadd.xlane.f32.xlu1 %v503_v0  ;;  %v4153_v55 = vsub.f32 %v3207_v14, %v424_v47  ;;  %v3627_v0 = vld [vmem:[%s5237_s1 + $0xa0] ss:$16 sps:$4 sm:$0xff]   ;;  %v3629_v14 = vld [vmem:[%s5237_s1 + $0xc4] ss:$16 sps:$4 sm:$0xff]   ;;  %v4174_v8 = vsub.f32 %v3208_v15, %v425_v61  ;;  %v3637_v15 = vld [vmem:[%s5237_s1 + $0xec] ss:$16 sps:$4 sm:$0xff]   ;;  %v3251_v61 = vunpack.c.l.bf16 %v4219_v7 }
  0xbe   : > { %v352_v2 = vpop.xlane.xlu0 %351  ;;  %v354_v37 = vpop.xlane.xlu1 %353 }
  0xbf   : > { %1040 = vmatpush1.bf16.msra.mxu0 %v3627_v0  ;;  %1283 = vmatpush1.bf16.msra.mxu1 %v3628_v1  ;;  %v508_v31 = vmul.f32 %v4153_v55, %v4153_v55  ;;  %v426_v33 = vmul.f32 0.0078125, %v352_v2  ;;  %v509_v39 = vmul.f32 %v4174_v8, %v4174_v8  ;;  %v427_v11 = vmul.f32 0.0078125, %v354_v37 }
  0xc0   : > { %1041 = vmatprep.subr.bf16.mxu0 %v3629_v14  ;;  %v3252_v14 = vunpack.c.h.bf16 %v4219_v7 }
  0xc1   : > { %377 = vadd.xlane.f32.xlu1 %v3236_v4  ;;  %550 = vadd.xlane.f32.xlu0 %v504_v5  ;;  %v3631_v5 = vld [vmem:[%s5237_s1 + $0xcc] ss:$16 sps:$4 sm:$0xff]   ;;  %v4198_v38 = vsub.f32 %v3211_v17, %v426_v33  ;;  %v4213_v17 = vsub.f32 %v3212_v18, %v427_v11 }
  0xc2   : > { %1284 = vmatprep.subr.bf16.mxu1 %v3631_v5  ;;  %v356_v47 = vpop.xlane.xlu0 %355  ;;  %v358_v12 = vpop.xlane.xlu1 %357  ;;  %v4265_v11 = vld [vmem:[%s3917_s7 + $0x88] sm:$0xff]  }
  0xc3   : > { %1042 = vmatpush1.bf16.msra.mxu0 %v3633_v6  ;;  %1285 = vmatpush1.bf16.msra.mxu1 %v3634_v9  ;;  %v510_v49 = vmul.f32 %v4198_v38, %v4198_v38  ;;  %v428_v54 = vmul.f32 0.0078125, %v356_v47  ;;  %v511_v18 = vmul.f32 %v4213_v17, %v4213_v17  ;;  %v429_v0 = vmul.f32 0.0078125, %v358_v12 }
  0xc4   : > { %1043 = vmatprep.subr.bf16.mxu0 %v3635_v10  ;;  %1286 = vmatprep.subr.bf16.mxu1 %v3637_v15  ;;  %v3260_v12 = vunpack.c.h.bf16 %v4265_v11 }
  0xc5   : > { %552 = vadd.xlane.f32.xlu1 %v505_v35  ;;  %379 = vadd.xlane.f32.xlu0 %v3239_v36  ;;  %v4186_v35 = vld [vmem:[%s3917_s7 + $0x70] sm:$0xff]   ;;  %v4229_v13 = vsub.f32 %v3215_v19, %v428_v54  ;;  %v4238_v2 = vsub.f32 %v3216_v20, %v429_v0 }
  0xc6   : > { %v3247_v40 = vunpack.c.l.bf16 %v4186_v35  ;;  %v3248_v48 = vunpack.c.h.bf16 %v4186_v35  ;;  %v360_v1 = vpop.xlane.xlu0 %359  ;;  %v362_v33 = vpop.xlane.xlu1 %361  ;;  %v4286_v0 = vld [vmem:[%s3917_s7 + $0x90] sm:$0xff]  }
  0xc7   : > { %1044 = vmatpush1.bf16.msra.mxu0 %v3639_v41  ;;  %v512_v19 = vmul.f32 %v4229_v13, %v4229_v13  ;;  %v430_v5 = vmul.f32 0.0078125, %v360_v1  ;;  %v513_v16 = vmul.f32 %v4238_v2, %v4238_v2  ;;  %v431_v9 = vmul.f32 0.0078125, %v362_v33 }
  0xc9   : > { %381 = vadd.xlane.f32.xlu1 %v3240_v44  ;;  %554 = vadd.xlane.f32.xlu0 %v506_v45  ;;  %v3640_v45 = vld [vmem:[%s5237_s1 + $0xe8] ss:$16 sps:$4 sm:$0xff]   ;;  %v4250_v6 = vsub.f32 %v3219_v22, %v430_v5  ;;  %v4259_v10 = vsub.f32 %v3220_v23, %v431_v9  ;;  %v3259_v23 = vunpack.c.l.bf16 %v4265_v11 }
  0xca   : > { %1287 = vmatpush1.bf16.msra.mxu1 %v3640_v45  ;;  %v364_v37 = vpop.xlane.xlu0 %363  ;;  %v366_v41 = vpop.xlane.xlu1 %365  ;;  %v4307_v9 = vld [vmem:[%s3917_s7 + $0x98] sm:$0xff]  }
  0xcb   : > { %v514_v22 = vmul.f32 %v4250_v6, %v4250_v6  ;;  %v515_v21 = vmul.f32 %v4259_v10, %v4259_v10  ;;  %v433_v47 = vmul.f32 0.0078125, %v366_v41  ;;  %v5242_v27 = vunpack.c.h.bf16 %v4307_v9 }
  0xcd   : > { %556 = vadd.xlane.f32.xlu1 %v507_v57  ;;  %383 = vadd.xlane.f32.xlu0 %v3243_v59  ;;  %v3849_v57 = vmov 0   ;;  %v4280_v54 = vsub.f32 %v3224_v26, %v433_v47  ;;  %v3263_v26 = vunpack.c.l.bf16 %v4286_v0 }
  0xce   : > { %1061 = vmatprep.mubr.bf16.mxu0 %v3849_v57  ;;  %1304 = vmatprep.mubr.bf16.mxu1 %v3849_v57  ;;  %v370_v1 = vpop.xlane.xlu1 %369 }
  0xcf   : > { %2030 = vmatprep.subr.bf16.mxu1 %v3849_v57  ;;  %2231 = vmatprep.subr.bf16.mxu0 %v3849_v57  ;;  %v517_v24 = vmul.f32 %v4280_v54, %v4280_v54  ;;  %v435_v5 = vmul.f32 0.0078125, %v370_v1 }
  0xd1   : > { %385 = vadd.xlane.f32.xlu1 %v3244_v30  ;;  %558 = vadd.xlane.f32.xlu0 %v508_v31  ;;  %v4244_v31 = vld [vmem:[%s3917_s7 + $0x80] sm:$0xff]   ;;  %v4301_v33 = vsub.f32 %v3228_v29, %v435_v5 }
  0xd2   : > { %v3255_v20 = vunpack.c.l.bf16 %v4244_v31  ;;  %v3256_v15 = vunpack.c.h.bf16 %v4244_v31 }
  0xd5   : > { %560 = vadd.xlane.f32.xlu1 %v509_v39  ;;  %387 = vadd.xlane.f32.xlu0 %v3247_v40  ;;  %v432_v39 = vmul.f32 0.0078125, %v364_v37  ;;  %v519_v37 = vmul.f32 %v4301_v33, %v4301_v33 }
  0xd7   : > { %v4271_v45 = vsub.f32 %v3223_v25, %v432_v39 }
  0xd9   : > { %389 = vadd.xlane.f32.xlu1 %v3248_v48  ;;  %562 = vadd.xlane.f32.xlu0 %v510_v49  ;;  %v368_v49 = vpop.xlane.xlu0 %367  ;;  %v516_v25 = vmul.f32 %v4271_v45, %v4271_v45 }
  0xdd   : > { %564 = vadd.xlane.f32.xlu1 %v511_v18  ;;  %391 = vadd.xlane.f32.xlu0 %v3251_v61  ;;  %v434_v18 = vmul.f32 0.0078125, %v368_v49 }
  0xe1   : > { %393 = vadd.xlane.f32.xlu1 %v3252_v14  ;;  %566 = vadd.xlane.f32.xlu0 %v512_v19  ;;  %v4292_v19 = vsub.f32 %v3227_v28, %v434_v18 }
  0xe3   : > { %v518_v28 = vmul.f32 %v4292_v19, %v4292_v19 }
  0xe5   : > { %568 = vadd.xlane.f32.xlu1 %v513_v16  ;;  %395 = vadd.xlane.f32.xlu0 %v3255_v20  ;;  %v5245_v16 = vunpack.c.h.bf16 %v4286_v0 }
  0xe9   : > { %397 = vadd.xlane.f32.xlu1 %v3256_v15  ;;  %570 = vadd.xlane.f32.xlu0 %v514_v22  ;;  %v5244_v22 = vunpack.c.l.bf16 %v4307_v9 }
  0xed   : > { %572 = vadd.xlane.f32.xlu1 %v515_v21  ;;  %399 = vadd.xlane.f32.xlu0 %v3259_v23 }
  0xf1   : > { %401 = vadd.xlane.f32.xlu1 %v3260_v12  ;;  %574 = vadd.xlane.f32.xlu0 %v516_v25 }
  0xf5   : > { %576 = vadd.xlane.f32.xlu1 %v517_v24  ;;  %403 = vadd.xlane.f32.xlu0 %v3263_v26 }
  0xf9   : > { %405 = vadd.xlane.f32.xlu1 %v5245_v16  ;;  %578 = vadd.xlane.f32.xlu0 %v518_v28  ;;  %v4324_v28 = vld [vmem:[%s3917_s7 + $0xa0] sm:$0xff]  }
  0xfa   : > { %v3272_v46 = vunpack.c.h.bf16 %v4324_v28 }
  0xfd   : > { %580 = vadd.xlane.f32.xlu1 %v519_v37  ;;  %407 = vadd.xlane.f32.xlu0 %v5244_v22 }
 0x101   : > { %409 = vadd.xlane.f32.xlu1 %v5242_v27 }
 0x13e   : > { %v543_v29 = vpop.xlane.xlu0 %542 }
 0x13f   : > { %v626_v39 = vmul.f32 0.0078125, %v543_v29 }
 0x141   : > { %v668_v41 = vadd.f32 1e-05, %v626_v39 }
 0x142   : > { %v545_v21 = vpop.xlane.xlu1 %544  ;;  %v372_v47 = vpop.xlane.xlu0 %371 }
 0x143   : > { %v627_v49 = vmul.f32 0.0078125, %v545_v21  ;;  %v436_v25 = vmul.f32 0.0078125, %v372_v47  ;;  %3673 = vrsqrt.f32 %v668_v41  ;;  %v5243_v21 = vunpack.c.l.bf16 %v4324_v28 }
 0x145   : > { %v669_v18 = vadd.f32 1e-05, %v627_v49  ;;  %v4321_v1 = vsub.f32 %v3231_v52, %v436_v25 }
 0x146   : > { %v374_v24 = vpop.xlane.xlu1 %373  ;;  %v547_v5 = vpop.xlane.xlu0 %546 }
 0x147   : > { %3675 = vrsqrt.f32 %v669_v18  ;;  %v437_v37 = vmul.f32 0.0078125, %v374_v24  ;;  %v628_v27 = vmul.f32 0.0078125, %v547_v5  ;;  %v520_v29 = vmul.f32 %v4321_v1, %v4321_v1 }
 0x149   : > { %v4330_v39 = vsub.f32 %v3232_v58, %v437_v37  ;;  %v670_v41 = vadd.f32 1e-05, %v628_v27  ;;  %582 = vadd.xlane.f32.xlu0 %v520_v29 }
 0x14a   : > { %v549_v52 = vpop.xlane.xlu1 %548  ;;  %v376_v47 = vpop.xlane.xlu0 %375 }
 0x14b   : > { %v629_v49 = vmul.f32 0.0078125, %v549_v52  ;;  %v438_v25 = vmul.f32 0.0078125, %v376_v47  ;;  %v521_v18 = vmul.f32 %v4330_v39, %v4330_v39  ;;  %3677 = vrsqrt.f32 %v670_v41 }
 0x14d   : > { %v671_v24 = vadd.f32 1e-05, %v629_v49  ;;  %v4337_v5 = vsub.f32 %v3235_v63, %v438_v25  ;;  %584 = vadd.xlane.f32.xlu1 %v521_v18  ;;  %411 = vadd.xlane.f32.xlu0 %v5243_v21  ;;  %v3674_v37 = vpop.eup %3673 }
 0x14e   : > { %v378_v58 = vpop.xlane.xlu1 %377  ;;  %v551_v27 = vpop.xlane.xlu0 %550  ;;  %v752_v21 = vmul.f32 %v3674_v37, %v4041_v43 }
 0x14f   : > { %3679 = vrsqrt.f32 %v671_v24  ;;  %v439_v29 = vmul.f32 0.0078125, %v378_v58  ;;  %v630_v52 = vmul.f32 0.0078125, %v551_v27  ;;  %v522_v41 = vmul.f32 %v4337_v5, %v4337_v5 }
 0x151   : > { %v3676_v47 = vpop.eup %3675  ;;  %v4346_v63 = vsub.f32 %v3236_v4, %v439_v29  ;;  %v672_v49 = vadd.f32 1e-05, %v630_v52  ;;  %413 = vadd.xlane.f32.xlu1 %v3272_v46  ;;  %586 = vadd.xlane.f32.xlu0 %v522_v41 }
 0x152   : > { %v553_v25 = vpop.xlane.xlu1 %552  ;;  %v380_v18 = vpop.xlane.xlu0 %379  ;;  %v753_v24 = vmul.f32 %v3676_v47, %v4050_v50 }
 0x153   : > { %v631_v58 = vmul.f32 0.0078125, %v553_v25  ;;  %v440_v27 = vmul.f32 0.0078125, %v380_v18  ;;  %v523_v22 = vmul.f32 %v4346_v63, %v4346_v63  ;;  %3681 = vrsqrt.f32 %v672_v49 }
 0x154   : > { %v794_v16 = vpack.c.bf16 %v753_v24, %v752_v21 }
 0x155   : > { %v673_v60 = vadd.f32 1e-05, %v631_v58  ;;  %v4356_v4 = vsub.f32 %v3239_v36, %v440_v27  ;;  %588 = vadd.xlane.f32.xlu1 %v523_v22  ;;  %v3678_v43 = vpop.eup %3677 }
 0x156   : > { %v382_v29 = vpop.xlane.xlu1 %381  ;;  %1062 = vmatmul.mubr.bf16.vlgmr.msra.gmra.mrb[0].mxu0 %v794_v16  ;;  %1305 = vmatmul.mubr.bf16.vlgmr.msra.gmra.mrb[0].mxu1 %v794_v16  ;;  %v555_v52 = vpop.xlane.xlu0 %554  ;;  %v754_v49 = vmul.f32 %v3678_v43, %v4054_v51 }
 0x157   : > { %3683 = vrsqrt.f32 %v673_v60  ;;  %v441_v50 = vmul.f32 0.0078125, %v382_v29  ;;  %v632_v37 = vmul.f32 0.0078125, %v555_v52  ;;  %v524_v41 = vmul.f32 %v4356_v4, %v4356_v4  ;;  %1071 = vmatprep.mubr.bf16.mxu0 %v3849_v57  ;;  %1314 = vmatprep.mubr.bf16.mxu1 %v3849_v57 }
 0x159   : > { %v3680_v21 = vpop.eup %3679  ;;  %v4364_v36 = vsub.f32 %v3240_v44, %v441_v50  ;;  %v674_v22 = vadd.f32 1e-05, %v632_v37  ;;  %590 = vadd.xlane.f32.xlu0 %v524_v41 }
 0x15a   : > { %v557_v16 = vpop.xlane.xlu1 %556  ;;  %v384_v47 = vpop.xlane.xlu0 %383  ;;  %v755_v25 = vmul.f32 %v3680_v21, %v4063_v56 }
 0x15b   : > { %v633_v18 = vmul.f32 0.0078125, %v557_v16  ;;  %v442_v24 = vmul.f32 0.0078125, %v384_v47  ;;  %v525_v58 = vmul.f32 %v4364_v36, %v4364_v36  ;;  %3685 = vrsqrt.f32 %v674_v22 }
 0x15c   : > { %v795_v27 = vpack.c.bf16 %v755_v25, %v754_v49 }
 0x15d   : > { %v675_v60 = vadd.f32 1e-05, %v633_v18  ;;  %v4372_v32 = vsub.f32 %v3243_v59, %v442_v24  ;;  %592 = vadd.xlane.f32.xlu1 %v525_v58  ;;  %v3682_v51 = vpop.eup %3681 }
 0x15e   : > { %v386_v44 = vpop.xlane.xlu1 %385  ;;  %1072 = vmatmul.mubr.bf16.gmra.mrb[4].mxu0 %v795_v27  ;;  %1315 = vmatmul.mubr.bf16.gmra.mrb[4].mxu1 %v795_v27  ;;  %v559_v29 = vpop.xlane.xlu0 %558  ;;  %v756_v22 = vmul.f32 %v3682_v51, %v4075_v62 }
 0x15f   : > { %3687 = vrsqrt.f32 %v675_v60  ;;  %v443_v56 = vmul.f32 0.0078125, %v386_v44  ;;  %v634_v52 = vmul.f32 0.0078125, %v559_v29  ;;  %v526_v43 = vmul.f32 %v4372_v32, %v4372_v32  ;;  %1081 = vmatprep.mubr.bf16.mxu0 %v3849_v57  ;;  %1324 = vmatprep.mubr.bf16.mxu1 %v3849_v57 }
 0x161   : > { %v3684_v50 = vpop.eup %3683  ;;  %v4380_v59 = vsub.f32 %v3244_v30, %v443_v56  ;;  %v676_v37 = vadd.f32 1e-05, %v634_v52  ;;  %594 = vadd.xlane.f32.xlu0 %v526_v43 }
 0x162   : > { %v561_v41 = vpop.xlane.xlu1 %560  ;;  %v388_v21 = vpop.xlane.xlu0 %387  ;;  %v757_v16 = vmul.f32 %v3684_v50, %v4084_v3 }
 0x163   : > { %v635_v47 = vmul.f32 0.0078125, %v561_v41  ;;  %v444_v49 = vmul.f32 0.0078125, %v388_v21  ;;  %v527_v25 = vmul.f32 %v4380_v59, %v4380_v59  ;;  %3689 = vrsqrt.f32 %v676_v37 }
 0x164   : > { %v796_v18 = vpack.c.bf16 %v757_v16, %v756_v22 }
 0x165   : > { %v677_v24 = vadd.f32 1e-05, %v635_v47  ;;  %v4388_v53 = vsub.f32 %v3247_v40, %v444_v49  ;;  %596 = vadd.xlane.f32.xlu1 %v527_v25  ;;  %v3686_v62 = vpop.eup %3685 }
 0x166   : > { %v390_v30 = vpop.xlane.xlu1 %389  ;;  %1082 = vmatmul.mubr.bf16.gmra.mrb[8].mxu0 %v796_v18  ;;  %1325 = vmatmul.mubr.bf16.gmra.mrb[8].mxu1 %v796_v18  ;;  %v563_v58 = vpop.xlane.xlu0 %562  ;;  %v758_v52 = vmul.f32 %v3686_v62, %v4108_v34 }
 0x167   : > { %3691 = vrsqrt.f32 %v677_v24  ;;  %v445_v3 = vmul.f32 0.0078125, %v390_v30  ;;  %v636_v27 = vmul.f32 0.0078125, %v563_v58  ;;  %v528_v60 = vmul.f32 %v4388_v53, %v4388_v53  ;;  %1091 = vmatprep.mubr.bf16.mxu0 %v3849_v57  ;;  %1334 = vmatprep.mubr.bf16.mxu1 %v3849_v57 }
 0x169   : > { %v3688_v44 = vpop.eup %3687  ;;  %v4396_v40 = vsub.f32 %v3248_v48, %v445_v3  ;;  %v678_v29 = vadd.f32 1e-05, %v636_v27  ;;  %598 = vadd.xlane.f32.xlu0 %v528_v60 }
 0x16a   : > { %v565_v51 = vpop.xlane.xlu1 %564  ;;  %v392_v56 = vpop.xlane.xlu0 %391  ;;  %v759_v43 = vmul.f32 %v3688_v44, %v4129_v42 }
 0x16b   : > { %v637_v50 = vmul.f32 0.0078125, %v565_v51  ;;  %v446_v37 = vmul.f32 0.0078125, %v392_v56  ;;  %v529_v41 = vmul.f32 %v4396_v40, %v4396_v40  ;;  %3693 = vrsqrt.f32 %v678_v29 }
 0x16c   : > { %v797_v21 = vpack.c.bf16 %v759_v43, %v758_v52 }
 0x16d   : > { %v679_v22 = vadd.f32 1e-05, %v637_v50  ;;  %v4404_v35 = vsub.f32 %v3251_v61, %v446_v37  ;;  %600 = vadd.xlane.f32.xlu1 %v529_v41  ;;  %v3690_v34 = vpop.eup %3689 }
 0x16e   : > { %v394_v48 = vpop.xlane.xlu1 %393  ;;  %1092 = vmatmul.mubr.bf16.gmra.mrb[12].mxu0 %v797_v21  ;;  %1335 = vmatmul.mubr.bf16.gmra.mrb[12].mxu1 %v797_v21  ;;  %v567_v16 = vpop.xlane.xlu0 %566  ;;  %v760_v58 = vmul.f32 %v3690_v34, %v4153_v55 }
 0x16f   : > { %3695 = vrsqrt.f32 %v679_v22  ;;  %v447_v42 = vmul.f32 0.0078125, %v394_v48  ;;  %v638_v47 = vmul.f32 0.0078125, %v567_v16  ;;  %v530_v49 = vmul.f32 %v4404_v35, %v4404_v35  ;;  %1101 = vmatprep.mubr.bf16.mxu0 %v3849_v57  ;;  %1344 = vmatprep.mubr.bf16.mxu1 %v3849_v57 }
 0x171   : > { %v3692_v25 = vpop.eup %3691  ;;  %v4412_v61 = vsub.f32 %v3252_v14, %v447_v42  ;;  %v680_v18 = vadd.f32 1e-05, %v638_v47  ;;  %602 = vadd.xlane.f32.xlu0 %v530_v49 }
 0x172   : > { %v569_v24 = vpop.xlane.xlu1 %568  ;;  %v396_v30 = vpop.xlane.xlu0 %395  ;;  %v761_v62 = vmul.f32 %v3692_v25, %v4174_v8 }
 0x173   : > { %v639_v3 = vmul.f32 0.0078125, %v569_v24  ;;  %v448_v27 = vmul.f32 0.0078125, %v396_v30  ;;  %v531_v60 = vmul.f32 %v4412_v61, %v4412_v61  ;;  %3697 = vrsqrt.f32 %v680_v18 }
 0x174   : > { %v798_v44 = vpack.c.bf16 %v761_v62, %v760_v58 }
 0x175   : > { %v681_v29 = vadd.f32 1e-05, %v639_v3  ;;  %v4420_v7 = vsub.f32 %v3255_v20, %v448_v27  ;;  %604 = vadd.xlane.f32.xlu1 %v531_v60  ;;  %v3694_v55 = vpop.eup %3693 }
 0x176   : > { %v398_v14 = vpop.xlane.xlu1 %397  ;;  %1102 = vmatmul.mubr.bf16.gmra.mrb[16].mxu0 %v798_v44  ;;  %1345 = vmatmul.mubr.bf16.gmra.mrb[16].mxu1 %v798_v44  ;;  %v571_v51 = vpop.xlane.xlu0 %570  ;;  %v762_v21 = vmul.f32 %v3694_v55, %v4198_v38 }
 0x177   : > { %3699 = vrsqrt.f32 %v681_v29  ;;  %v449_v8 = vmul.f32 0.0078125, %v398_v14  ;;  %v640_v56 = vmul.f32 0.0078125, %v571_v51  ;;  %v532_v52 = vmul.f32 %v4420_v7, %v4420_v7  ;;  %1111 = vmatprep.mubr.bf16.mxu0 %v3849_v57  ;;  %1354 = vmatprep.mubr.bf16.mxu1 %v3849_v57 }
 0x179   : > { %v3696_v43 = vpop.eup %3695  ;;  %v4428_v20 = vsub.f32 %v3256_v15, %v449_v8  ;;  %v682_v50 = vadd.f32 1e-05, %v640_v56  ;;  %606 = vadd.xlane.f32.xlu0 %v532_v52 }
 0x17a   : > { %v573_v37 = vpop.xlane.xlu1 %572  ;;  %v400_v41 = vpop.xlane.xlu0 %399  ;;  %v763_v22 = vmul.f32 %v3696_v43, %v4213_v17 }
 0x17b   : > { %v641_v48 = vmul.f32 0.0078125, %v573_v37  ;;  %v450_v16 = vmul.f32 0.0078125, %v400_v41  ;;  %v533_v34 = vmul.f32 %v4428_v20, %v4428_v20  ;;  %3701 = vrsqrt.f32 %v682_v50 }
 0x17c   : > { %v799_v42 = vpack.c.bf16 %v763_v22, %v762_v21 }
 0x17d   : > { %v683_v47 = vadd.f32 1e-05, %v641_v48  ;;  %v4436_v31 = vsub.f32 %v3259_v23, %v450_v16  ;;  %608 = vadd.xlane.f32.xlu1 %v533_v34  ;;  %v3698_v38 = vpop.eup %3697 }
 0x17e   : > { %v402_v15 = vpop.xlane.xlu1 %401  ;;  %1112 = vmatmul.mubr.bf16.gmra.mrb[20].mxu0 %v799_v42  ;;  %1355 = vmatmul.mubr.bf16.gmra.mrb[20].mxu1 %v799_v42  ;;  %v575_v49 = vpop.xlane.xlu0 %574  ;;  %v764_v3 = vmul.f32 %v3698_v38, %v4229_v13 }
 0x17f   : > { %3703 = vrsqrt.f32 %v683_v47  ;;  %v451_v17 = vmul.f32 0.0078125, %v402_v15  ;;  %v642_v25 = vmul.f32 0.0078125, %v575_v49  ;;  %v534_v18 = vmul.f32 %v4436_v31, %v4436_v31  ;;  %1121 = vmatprep.mubr.bf16.mxu0 %v3849_v57  ;;  %1364 = vmatprep.mubr.bf16.mxu1 %v3849_v57 }
 0x181   : > { %v3700_v24 = vpop.eup %3699  ;;  %v4444_v23 = vsub.f32 %v3260_v12, %v451_v17  ;;  %v684_v30 = vadd.f32 1e-05, %v642_v25  ;;  %610 = vadd.xlane.f32.xlu0 %v534_v18  ;;  %v5249_v25 = vunpack.c.h.bf16 %v4307_v9 }
 0x182   : > { %v577_v58 = vpop.xlane.xlu1 %576  ;;  %v404_v62 = vpop.xlane.xlu0 %403  ;;  %v765_v27 = vmul.f32 %v3700_v24, %v4238_v2 }
 0x183   : > { %v643_v60 = vmul.f32 0.0078125, %v577_v58  ;;  %v452_v44 = vmul.f32 0.0078125, %v404_v62  ;;  %v535_v29 = vmul.f32 %v4444_v23, %v4444_v23  ;;  %3705 = vrsqrt.f32 %v684_v30 }
 0x184   : > { %v800_v14 = vpack.c.bf16 %v765_v27, %v764_v3 }
 0x185   : > { %v685_v51 = vadd.f32 1e-05, %v643_v60  ;;  %v4452_v11 = vsub.f32 %v3263_v26, %v452_v44  ;;  %612 = vadd.xlane.f32.xlu1 %v535_v29  ;;  %v3702_v13 = vpop.eup %3701  ;;  %v5247_v26 = vunpack.c.h.bf16 %v4286_v0  ;;  %v5248_v0 = vunpack.c.l.bf16 %v4307_v9  ;;  %v3642_v44 = vld [vmem:[%s5239_s3 + $0x80] sm:$0xff]   ;;  %v3645_v29 = vld [vmem:[%s5239_s3 + $0x10] sm:$0xff]  }
 0x186   : > { %v406_v12 = vpop.xlane.xlu1 %405  ;;  %1122 = vmatmul.mubr.bf16.gmra.mrb[24].mxu0 %v800_v14  ;;  %1365 = vmatmul.mubr.bf16.gmra.mrb[24].mxu1 %v800_v14  ;;  %v579_v55 = vpop.xlane.xlu0 %578  ;;  %v766_v21 = vmul.f32 %v3702_v13, %v4250_v6  ;;  %v3646_v14 = vld [vmem:[%s5239_s3 + $0x90] sm:$0xff]   ;;  %v3650_v13 = vld [vmem:[%s5239_s3 + $0xa0] sm:$0xff]  }
 0x187   : > { %3707 = vrsqrt.f32 %v685_v51  ;;  %v453_v2 = vmul.f32 0.0078125, %v406_v12  ;;  %v644_v8 = vmul.f32 0.0078125, %v579_v55  ;;  %v536_v56 = vmul.f32 %v4452_v11, %v4452_v11  ;;  %1131 = vmatprep.mubr.bf16.mxu0 %v3849_v57  ;;  %1374 = vmatprep.mubr.bf16.mxu1 %v3849_v57  ;;  %v3647_v51 = vld [vmem:[%s5239_s3 + $0x18] sm:$0xff]   ;;  %v3649_v55 = vld [vmem:[%s5239_s3 + $0x20] sm:$0xff]  }
 0x188   : > { %2232 = vmatpush1.bf16.msra.mxu0 %v3642_v44  ;;  %v3648_v12 = vld [vmem:[%s5239_s3 + $0x98] sm:$0xff]  }
 0x189   : > { %v3704_v52 = vpop.eup %3703  ;;  %v4460_v43 = vsub.f32 %v5247_v26, %v453_v2  ;;  %v686_v50 = vadd.f32 1e-05, %v644_v8  ;;  %614 = vadd.xlane.f32.xlu0 %v536_v56  ;;  %2233 = vmatprep.subr.bf16.mxu0 %v3849_v57  ;;  %v3651_v2 = vld [vmem:[%s5239_s3 + $0x28] sm:$0xff]  }
 0x18a   : > { %v581_v37 = vpop.xlane.xlu1 %580  ;;  %v408_v41 = vpop.xlane.xlu0 %407  ;;  %v767_v22 = vmul.f32 %v3704_v52, %v4259_v10  ;;  %v3652_v52 = vld [vmem:[%s5239_s3 + $0xa8] sm:$0xff]  }
 0x18b   : > { %v645_v48 = vmul.f32 0.0078125, %v581_v37  ;;  %v454_v16 = vmul.f32 0.0078125, %v408_v41  ;;  %v537_v34 = vmul.f32 %v4460_v43, %v4460_v43  ;;  %3709 = vrsqrt.f32 %v686_v50 }
 0x18c   : > { %v801_v42 = vpack.c.bf16 %v767_v22, %v766_v21 }
 0x18d   : > { %v687_v47 = vadd.f32 1e-05, %v645_v48  ;;  %v4468_v15 = vsub.f32 %v5248_v0, %v454_v16  ;;  %616 = vadd.xlane.f32.xlu1 %v537_v34  ;;  %v3706_v38 = vpop.eup %3705  ;;  %v5250_v48 = vunpack.c.l.bf16 %v4324_v28 }
 0x18e   : > { %v410_v49 = vpop.xlane.xlu1 %409  ;;  %1132 = vmatmul.mubr.bf16.gmra.mrb[28].mxu0 %v801_v42  ;;  %1375 = vmatmul.mubr.bf16.gmra.mrb[28].mxu1 %v801_v42  ;;  %v768_v24 = vmul.f32 %v3706_v38, %v4271_v45  ;;  %v3653_v38 = vld [vmem:[%s5239_s3 + $0x30] sm:$0xff]  }
 0x18f   : > { %3711 = vrsqrt.f32 %v687_v47  ;;  %v455_v6 = vmul.f32 0.0078125, %v410_v49  ;;  %v538_v10 = vmul.f32 %v4468_v15, %v4468_v15  ;;  %1141 = vmatprep.mubr.bf16.mxu0 %v3849_v57  ;;  %1384 = vmatprep.mubr.bf16.mxu1 %v3849_v57 }
 0x191   : > { %v3708_v17 = vpop.eup %3707  ;;  %v4476_v18 = vsub.f32 %v5249_v25, %v455_v6  ;;  %618 = vadd.xlane.f32.xlu0 %v538_v10 }
 0x192   : > { %v769_v30 = vmul.f32 %v3708_v17, %v4280_v54  ;;  %v3641_v54 = vld [vmem:[%s5239_s3] sm:$0xff]   ;;  %v3654_v17 = vld [vmem:[%s5239_s3 + $0xb0] sm:$0xff]  }
 0x193   : > { %v539_v58 = vmul.f32 %v4476_v18, %v4476_v18  ;;  %2031 = vmatpush1.bf16.msra.mxu1 %v3641_v54 }
 0x194   : > { %v802_v62 = vpack.c.bf16 %v769_v30, %v768_v24  ;;  %2032 = vmatprep.subr.bf16.mxu1 %v3849_v57 }
 0x195   : > { %620 = vadd.xlane.f32.xlu1 %v539_v58  ;;  %v3710_v3 = vpop.eup %3709 }
 0x196   : > { %1142 = vmatmul.mubr.bf16.gmra.mrb[32].mxu0 %v802_v62  ;;  %1385 = vmatmul.mubr.bf16.gmra.mrb[32].mxu1 %v802_v62  ;;  %v770_v27 = vmul.f32 %v3710_v3, %v4292_v19  ;;  %v3643_v19 = vld [vmem:[%s5239_s3 + $0x8] sm:$0xff]  }
 0x197   : > { %1151 = vmatprep.mubr.bf16.mxu0 %v3849_v57  ;;  %1394 = vmatprep.mubr.bf16.mxu1 %v3849_v57 }
 0x198   : > { %2033 = vmatpush1.bf16.msra.mxu1 %v3643_v19 }
 0x199   : > { %v3712_v9 = vpop.eup %3711  ;;  %2034 = vmatprep.subr.bf16.mxu1 %v3849_v57 }
 0x19a   : > { %v771_v60 = vmul.f32 %v3712_v9, %v4301_v33  ;;  %v3644_v33 = vld [vmem:[%s5239_s3 + $0x88] sm:$0xff]  }
 0x19b   : > { %2234 = vmatpush1.bf16.msra.mxu0 %v3644_v33 }
 0x19c   : > { %v803_v45 = vpack.c.bf16 %v771_v60, %v770_v27  ;;  %2235 = vmatprep.subr.bf16.mxu0 %v3849_v57  ;;  %2035 = vmatpush1.bf16.msra.mxu1 %v3645_v29  ;;  %v3655_v27 = vld [vmem:[%s5239_s3 + $0x38] sm:$0xff]  }
 0x19d   : > { %2036 = vmatprep.subr.bf16.mxu1 %v3849_v57  ;;  %v3656_v60 = vld [vmem:[%s5239_s3 + $0xb8] sm:$0xff]  }
 0x19e   : > { %1152 = vmatmul.mubr.bf16.gmra.mrb[36].mxu0 %v803_v45  ;;  %1395 = vmatmul.mubr.bf16.gmra.mrb[36].mxu1 %v803_v45 }
 0x19f   : > { %1161 = vmatprep.mubr.bf16.mxu0 %v3849_v57  ;;  %1404 = vmatprep.mubr.bf16.mxu1 %v3849_v57 }
 0x1a0   : > { %2236 = vmatpush1.bf16.msra.mxu0 %v3646_v14  ;;  %2037 = vmatpush1.bf16.msra.mxu1 %v3647_v51 }
 0x1a1   : > { %2237 = vmatprep.subr.bf16.mxu0 %v3849_v57  ;;  %2038 = vmatprep.subr.bf16.mxu1 %v3849_v57 }
 0x1a4   : > { %2238 = vmatpush1.bf16.msra.mxu0 %v3648_v12  ;;  %2039 = vmatpush1.bf16.msra.mxu1 %v3649_v55 }
 0x1a5   : > { %2239 = vmatprep.subr.bf16.mxu0 %v3849_v57  ;;  %2040 = vmatprep.subr.bf16.mxu1 %v3849_v57 }
 0x1a8   : > { %2240 = vmatpush1.bf16.msra.mxu0 %v3650_v13  ;;  %2041 = vmatpush1.bf16.msra.mxu1 %v3651_v2 }
 0x1a9   : > { %2241 = vmatprep.subr.bf16.mxu0 %v3849_v57  ;;  %2042 = vmatprep.subr.bf16.mxu1 %v3849_v57 }
 0x1ac   : > { %2242 = vmatpush1.bf16.msra.mxu0 %v3652_v52  ;;  %2043 = vmatpush1.bf16.msra.mxu1 %v3653_v38  ;;  %v3663_v38 = vld [vmem:[%s5239_s3 + $0x58] sm:$0xff]  }
 0x1ad   : > { %2243 = vmatprep.subr.bf16.mxu0 %v3849_v57  ;;  %2044 = vmatprep.subr.bf16.mxu1 %v3849_v57 }
 0x1b0   : > { %2244 = vmatpush1.bf16.msra.mxu0 %v3654_v17  ;;  %2045 = vmatpush1.bf16.msra.mxu1 %v3655_v27 }
 0x1b1   : > { %2245 = vmatprep.subr.bf16.mxu0 %v3849_v57  ;;  %2046 = vmatprep.subr.bf16.mxu1 %v3849_v57 }
 0x1b4   : > { %2246 = vmatpush1.bf16.msra.mxu0 %v3656_v60 }
 0x1b5   : > { %2247 = vmatprep.subr.bf16.mxu0 %v3849_v57 }
 0x1d6   : > { %v583_v8 = vpop.xlane.xlu0 %582 }
 0x1d7   : > { %v646_v56 = vmul.f32 0.0078125, %v583_v8 }
 0x1d9   : > { %v688_v26 = vadd.f32 1e-05, %v646_v56 }
 0x1da   : > { %v585_v50 = vpop.xlane.xlu1 %584  ;;  %v412_v37 = vpop.xlane.xlu0 %411 }
 0x1db   : > { %v647_v41 = vmul.f32 0.0078125, %v585_v50  ;;  %v456_v21 = vmul.f32 0.0078125, %v412_v37  ;;  %3713 = vrsqrt.f32 %v688_v26  ;;  %v3659_v26 = vld [vmem:[%s5239_s3 + $0x48] sm:$0xff]  }
 0x1dc   : > { %v3660_v50 = vld [vmem:[%s5239_s3 + $0xc8] sm:$0xff]  }
 0x1dd   : > { %v689_v22 = vadd.f32 1e-05, %v647_v41  ;;  %v4538_v16 = vsub.f32 %v5250_v48, %v456_v21  ;;  %v3662_v48 = vld [vmem:[%s5239_s3 + $0xd0] sm:$0xff]  }
 0x1de   : > { %v414_v34 = vpop.xlane.xlu1 %413  ;;  %v587_v42 = vpop.xlane.xlu0 %586 }
 0x1df   : > { %3715 = vrsqrt.f32 %v689_v22  ;;  %v457_v47 = vmul.f32 0.0078125, %v414_v34  ;;  %v648_v0 = vmul.f32 0.0078125, %v587_v42  ;;  %v540_v49 = vmul.f32 %v4538_v16, %v4538_v16  ;;  %v3661_v22 = vld [vmem:[%s5239_s3 + $0x50] sm:$0xff]  }
 0x1e1   : > { %v4547_v6 = vsub.f32 %v3272_v46, %v457_v47  ;;  %v690_v10 = vadd.f32 1e-05, %v648_v0  ;;  %622 = vadd.xlane.f32.xlu0 %v540_v49 }
 0x1e2   : > { %v589_v25 = vpop.xlane.xlu1 %588 }
 0x1e3   : > { %v649_v24 = vmul.f32 0.0078125, %v589_v25  ;;  %v541_v30 = vmul.f32 %v4547_v6, %v4547_v6  ;;  %3717 = vrsqrt.f32 %v690_v10  ;;  %v3664_v10 = vld [vmem:[%s5239_s3 + $0xd8] sm:$0xff]  }
 0x1e5   : > { %v691_v28 = vadd.f32 1e-05, %v649_v24  ;;  %624 = vadd.xlane.f32.xlu1 %v541_v30  ;;  %v3714_v58 = vpop.eup %3713 }
 0x1e6   : > { %v591_v46 = vpop.xlane.xlu0 %590  ;;  %v772_v54 = vmul.f32 %v3714_v58, %v4321_v1  ;;  %v3657_v1 = vld [vmem:[%s5239_s3 + $0x40] sm:$0xff]  }
 0x1e7   : > { %3719 = vrsqrt.f32 %v691_v28  ;;  %v650_v62 = vmul.f32 0.0078125, %v591_v46  ;;  %2047 = vmatpush1.bf16.msra.mxu1 %v3657_v1  ;;  %v3671_v1 = vld [vmem:[%s5239_s3 + $0x78] sm:$0xff]  }
 0x1e8   : > { %2048 = vmatprep.subr.bf16.mxu1 %v3849_v57 }
 0x1e9   : > { %v3716_v3 = vpop.eup %3715  ;;  %v692_v9 = vadd.f32 1e-05, %v650_v62 }
 0x1ea   : > { %v593_v45 = vpop.xlane.xlu1 %592  ;;  %v773_v44 = vmul.f32 %v3716_v3, %v4330_v39  ;;  %v3658_v39 = vld [vmem:[%s5239_s3 + $0xc0] sm:$0xff]   ;;  %v3667_v3 = vld [vmem:[%s5239_s3 + $0x68] sm:$0xff]  }
 0x1eb   : > { %v651_v19 = vmul.f32 0.0078125, %v593_v45  ;;  %3721 = vrsqrt.f32 %v692_v9  ;;  %2248 = vmatpush1.bf16.msra.mxu0 %v3658_v39  ;;  %2049 = vmatpush1.bf16.msra.mxu1 %v3659_v26  ;;  %v3668_v9 = vld [vmem:[%s5239_s3 + $0xe8] sm:$0xff]   ;;  %v3672_v39 = vld [vmem:[%s5239_s3 + $0xf8] sm:$0xff]  }
 0x1ec   : > { %v804_v33 = vpack.c.bf16 %v773_v44, %v772_v54  ;;  %2249 = vmatprep.subr.bf16.mxu0 %v3849_v57  ;;  %2050 = vmatprep.subr.bf16.mxu1 %v3849_v57 }
 0x1ed   : > { %v693_v29 = vadd.f32 1e-05, %v651_v19  ;;  %v3718_v51 = vpop.eup %3717 }
 0x1ee   : > { %1162 = vmatmul.mubr.bf16.gmra.mrb[40].mxu0 %v804_v33  ;;  %1405 = vmatmul.mubr.bf16.gmra.mrb[40].mxu1 %v804_v33  ;;  %v595_v14 = vpop.xlane.xlu0 %594  ;;  %v774_v8 = vmul.f32 %v3718_v51, %v4337_v5 }
 0x1ef   : > { %3723 = vrsqrt.f32 %v693_v29  ;;  %v652_v12 = vmul.f32 0.0078125, %v595_v14  ;;  %1171 = vmatprep.mubr.bf16.mxu0 %v3849_v57  ;;  %1414 = vmatprep.mubr.bf16.mxu1 %v3849_v57  ;;  %v3669_v29 = vld [vmem:[%s5239_s3 + $0x70] sm:$0xff]  }
 0x1f0   : > { %2250 = vmatpush1.bf16.msra.mxu0 %v3660_v50  ;;  %2051 = vmatpush1.bf16.msra.mxu1 %v3661_v22  ;;  %v3670_v14 = vld [vmem:[%s5239_s3 + $0xf0] sm:$0xff]  }
 0x1f1   : > { %v3720_v55 = vpop.eup %3719  ;;  %v694_v13 = vadd.f32 1e-05, %v652_v12  ;;  %2251 = vmatprep.subr.bf16.mxu0 %v3849_v57  ;;  %2052 = vmatprep.subr.bf16.mxu1 %v3849_v57 }
 0x1f2   : > { %v597_v2 = vpop.xlane.xlu1 %596  ;;  %v775_v56 = vmul.f32 %v3720_v55, %v4346_v63 }
 0x1f3   : > { %v653_v52 = vmul.f32 0.0078125, %v597_v2  ;;  %3725 = vrsqrt.f32 %v694_v13 }
 0x1f4   : > { %v805_v37 = vpack.c.bf16 %v775_v56, %v774_v8  ;;  %2252 = vmatpush1.bf16.msra.mxu0 %v3662_v48  ;;  %2053 = vmatpush1.bf16.msra.mxu1 %v3663_v38 }
 0x1f5   : > { %v695_v41 = vadd.f32 1e-05, %v653_v52  ;;  %v3722_v63 = vpop.eup %3721  ;;  %2253 = vmatprep.subr.bf16.mxu0 %v3849_v57  ;;  %2054 = vmatprep.subr.bf16.mxu1 %v3849_v57 }
 0x1f6   : > { %1172 = vmatmul.mubr.bf16.gmra.mrb[44].mxu0 %v805_v37  ;;  %1415 = vmatmul.mubr.bf16.gmra.mrb[44].mxu1 %v805_v37  ;;  %v599_v5 = vpop.xlane.xlu0 %598  ;;  %v776_v0 = vmul.f32 %v3722_v63, %v4356_v4  ;;  %v3665_v4 = vld [vmem:[%s5239_s3 + $0x60] sm:$0xff]  }
 0x1f7   : > { %3727 = vrsqrt.f32 %v695_v41  ;;  %v654_v21 = vmul.f32 0.0078125, %v599_v5  ;;  %1181 = vmatprep.mubr.bf16.mxu0 %v3849_v57  ;;  %1424 = vmatprep.mubr.bf16.mxu1 %v3849_v57 }
 0x1f8   : > { %2254 = vmatpush1.bf16.msra.mxu0 %v3664_v10  ;;  %2055 = vmatpush1.bf16.msra.mxu1 %v3665_v4 }
 0x1f9   : > { %v3724_v34 = vpop.eup %3723  ;;  %v696_v42 = vadd.f32 1e-05, %v654_v21  ;;  %2255 = vmatprep.subr.bf16.mxu0 %v3849_v57  ;;  %2056 = vmatprep.subr.bf16.mxu1 %v3849_v57 }
 0x1fa   : > { %v601_v47 = vpop.xlane.xlu1 %600  ;;  %v777_v49 = vmul.f32 %v3724_v34, %v4364_v36  ;;  %v3666_v36 = vld [vmem:[%s5239_s3 + $0xe0] sm:$0xff]  }
 0x1fb   : > { %v655_v17 = vmul.f32 0.0078125, %v601_v47  ;;  %3729 = vrsqrt.f32 %v696_v42 }
 0x1fc   : > { %v806_v25 = vpack.c.bf16 %v777_v49, %v776_v0  ;;  %2256 = vmatpush1.bf16.msra.mxu0 %v3666_v36  ;;  %2057 = vmatpush1.bf16.msra.mxu1 %v3667_v3  ;;  %v849_v49 = vlaneseq }
 0x1fd   : > { %v697_v24 = vadd.f32 1e-05, %v655_v17  ;;  %v3726_v28 = vpop.eup %3725  ;;  %2257 = vmatprep.subr.bf16.mxu0 %v3849_v57  ;;  %2058 = vmatprep.subr.bf16.mxu1 %v3849_v57 }
 0x1fe   : > { %1182 = vmatmul.mubr.bf16.gmra.mrb[48].mxu0 %v806_v25  ;;  %1425 = vmatmul.mubr.bf16.gmra.mrb[48].mxu1 %v806_v25  ;;  %v603_v30 = vpop.xlane.xlu0 %602  ;;  %v778_v60 = vmul.f32 %v3726_v28, %v4372_v32  ;;  %v850_v4 = vshrl.u32 %v849_v49, 7 }
 0x1ff   : > { %3731 = vrsqrt.f32 %v697_v24  ;;  %v656_v46 = vmul.f32 0.0078125, %v603_v30  ;;  %1191 = vmatprep.mubr.bf16.mxu0 %v3849_v57  ;;  %1434 = vmatprep.mubr.bf16.mxu1 %v3849_v57 }
 0x200   : > { %2258 = vmatpush1.bf16.msra.mxu0 %v3668_v9  ;;  %2059 = vmatpush1.bf16.msra.mxu1 %v3669_v29  ;;  %v859_v9 = vsub.s32 2, %v850_v4 }
 0x201   : > { %v3728_v58 = vpop.eup %3727  ;;  %v698_v62 = vadd.f32 1e-05, %v656_v46  ;;  %2259 = vmatprep.subr.bf16.mxu0 %v3849_v57  ;;  %2060 = vmatprep.subr.bf16.mxu1 %v3849_v57 }
 0x202   : > { %v605_v27 = vpop.xlane.xlu1 %604  ;;  %v779_v45 = vmul.f32 %v3728_v58, %v4380_v59  ;;  %v851_v58 = vsub.s32 0, %v850_v4 }
 0x203   : > { %v657_v54 = vmul.f32 0.0078125, %v605_v27  ;;  %3733 = vrsqrt.f32 %v698_v62 }
 0x204   : > { %v807_v44 = vpack.c.bf16 %v779_v45, %v778_v60  ;;  %2260 = vmatpush1.bf16.msra.mxu0 %v3670_v14  ;;  %2061 = vmatpush1.bf16.msra.mxu1 %v3671_v1  ;;  %v847_v60 = vld [vmem:[%s5238_s2] sm:$0xf]  ;;  %v855_v45 = vsub.s32 1, %v850_v4 }
 0x205   : > { %v699_v19 = vadd.f32 1e-05, %v657_v54  ;;  %v3730_v32 = vpop.eup %3729  ;;  %2261 = vmatprep.subr.bf16.mxu0 %v3849_v57  ;;  %v863_v54 = vsub.s32 3, %v850_v4  ;;  %v4661_v29 = vrot.slane %v847_v60, %v859_v9 }
 0x206   : > { %1192 = vmatmul.mubr.bf16.gmra.mrb[52].mxu0 %v807_v44  ;;  %1435 = vmatmul.mubr.bf16.gmra.mrb[52].mxu1 %v807_v44  ;;  %v607_v33 = vpop.xlane.xlu0 %606  ;;  %v780_v13 = vmul.f32 %v3730_v32, %v4388_v53 }
 0x207   : > { %3735 = vrsqrt.f32 %v699_v19  ;;  %v658_v59 = vmul.f32 0.0078125, %v607_v33  ;;  %1201 = vmatprep.mubr.bf16.mxu0 %v3849_v57  ;;  %1444 = vmatprep.mubr.bf16.mxu1 %v3849_v57  ;;  %v4659_v33 = vrot.slane %v847_v60, %v851_v58 }
 0x208   : > { %2262 = vmatpush1.bf16.msra.mxu0 %v3672_v39 }
 0x209   : > { %v3732_v51 = vpop.eup %3731  ;;  %v700_v12 = vadd.f32 1e-05, %v658_v59 }
 0x20a   : > { %v609_v55 = vpop.xlane.xlu1 %608  ;;  %v781_v2 = vmul.f32 %v3732_v51, %v4396_v40 }
 0x20b   : > { %v659_v8 = vmul.f32 0.0078125, %v609_v55  ;;  %3737 = vrsqrt.f32 %v700_v12 }
 0x20c   : > { %v808_v56 = vpack.c.bf16 %v781_v2, %v780_v13 }
 0x20d   : > { %v701_v52 = vadd.f32 1e-05, %v659_v8  ;;  %v3734_v50 = vpop.eup %3733 }
 0x20e   : > { %1202 = vmatmul.mubr.bf16.gmra.mrb[56].mxu0 %v808_v56  ;;  %1445 = vmatmul.mubr.bf16.gmra.mrb[56].mxu1 %v808_v56  ;;  %v611_v26 = vpop.xlane.xlu0 %610  ;;  %v782_v5 = vmul.f32 %v3734_v50, %v4404_v35 }
 0x20f   : > { %3739 = vrsqrt.f32 %v701_v52  ;;  %v660_v37 = vmul.f32 0.0078125, %v611_v26  ;;  %1211 = vmatprep.mubr.bf16.mxu0 %v3849_v57  ;;  %1454 = vmatprep.mubr.bf16.mxu1 %v3849_v57 }
 0x211   : > { %v3736_v53 = vpop.eup %3735  ;;  %v702_v40 = vadd.f32 1e-05, %v660_v37 }
 0x212   : > { %v613_v41 = vpop.xlane.xlu1 %612  ;;  %v783_v63 = vmul.f32 %v3736_v53, %v4412_v61 }
 0x213   : > { %v661_v21 = vmul.f32 0.0078125, %v613_v41  ;;  %3741 = vrsqrt.f32 %v702_v40 }
 0x214   : > { %v809_v22 = vpack.c.bf16 %v783_v63, %v782_v5 }
 0x215   : > { %v703_v48 = vadd.f32 1e-05, %v661_v21  ;;  %v3738_v42 = vpop.eup %3737 }
 0x216   : > { %1212 = vmatmul.mubr.bf16.gmra.mrb[60].mxu0 %v809_v22  ;;  %1455 = vmatmul.mubr.bf16.gmra.mrb[60].mxu1 %v809_v22  ;;  %v615_v34 = vpop.xlane.xlu0 %614  ;;  %v784_v61 = vmul.f32 %v3738_v42, %v4420_v7 }
 0x217   : > { %3743 = vrsqrt.f32 %v703_v48  ;;  %v662_v47 = vmul.f32 0.0078125, %v615_v34  ;;  %1221 = vmatprep.mubr.bf16.mxu0 %v3849_v57  ;;  %1464 = vmatprep.mubr.bf16.mxu1 %v3849_v57 }
 0x219   : > { %v3740_v0 = vpop.eup %3739  ;;  %v704_v38 = vadd.f32 1e-05, %v662_v47 }
 0x21a   : > { %v617_v35 = vpop.xlane.xlu1 %616  ;;  %v785_v10 = vmul.f32 %v3740_v0, %v4428_v20 }
 0x21b   : > { %v663_v17 = vmul.f32 0.0078125, %v617_v35  ;;  %3745 = vrsqrt.f32 %v704_v38 }
 0x21c   : > { %v810_v25 = vpack.c.bf16 %v785_v10, %v784_v61 }
 0x21d   : > { %v705_v24 = vadd.f32 1e-05, %v663_v17  ;;  %v3742_v30 = vpop.eup %3741 }
 0x21e   : > { %1222 = vmatmul.mubr.bf16.gmra.mrb[64].mxu0 %v810_v25  ;;  %1465 = vmatmul.mubr.bf16.gmra.mrb[64].mxu1 %v810_v25  ;;  %v619_v36 = vpop.xlane.xlu0 %618  ;;  %v786_v20 = vmul.f32 %v3742_v30, %v4436_v31  ;;  %v4663_v31 = vrot.slane %v847_v60, %v855_v45 }
 0x21f   : > { %3747 = vrsqrt.f32 %v705_v24  ;;  %v664_v28 = vmul.f32 0.0078125, %v619_v36  ;;  %1231 = vmatprep.mubr.bf16.mxu0 %v3849_v57  ;;  %1474 = vmatprep.mubr.bf16.mxu1 %v3849_v57 }
 0x221   : > { %v3744_v46 = vpop.eup %3743  ;;  %v706_v7 = vadd.f32 1e-05, %v664_v28 }
 0x222   : > { %v621_v62 = vpop.xlane.xlu1 %620  ;;  %v787_v3 = vmul.f32 %v3744_v46, %v4444_v23  ;;  %v4665_v23 = vrot.slane %v847_v60, %v863_v54 }
 0x223   : > { %v665_v27 = vmul.f32 0.0078125, %v621_v62  ;;  %3749 = vrsqrt.f32 %v706_v7 }
 0x224   : > { %v811_v44 = vpack.c.bf16 %v787_v3, %v786_v20 }
 0x225   : > { %v707_v19 = vadd.f32 1e-05, %v665_v27  ;;  %v3746_v32 = vpop.eup %3745 }
 0x226   : > { %1232 = vmatmul.mubr.bf16.gmra.mrb[68].mxu0 %v811_v44  ;;  %1475 = vmatmul.mubr.bf16.gmra.mrb[68].mxu1 %v811_v44  ;;  %v788_v40 = vmul.f32 %v3746_v32, %v4452_v11 }
 0x227   : > { %3751 = vrsqrt.f32 %v707_v19  ;;  %1241 = vmatprep.mubr.bf16.mxu0 %v3849_v57  ;;  %1484 = vmatprep.mubr.bf16.mxu1 %v3849_v57 }
 0x229   : > { %v3748_v59 = vpop.eup %3747  ;;  %v1063_v14 = vpop.f32.mrb[0].mxu0 }
 0x22a   : > { %v1306_v51 = vpop.f32.mrb[0].mxu1  ;;  %v1064_v12 = vadd.f32 %v1063_v14, %v4659_v33  ;;  %v1065_v39 = vpop.f32.mrb[1].mxu0  ;;  %v789_v13 = vmul.f32 %v3748_v59, %v4460_v43 }
 0x22b   : > { %v1307_v1 = vadd.f32 %v1306_v51, %v4661_v29  ;;  %v1308_v55 = vpop.f32.mrb[1].mxu1  ;;  %v1066_v2 = vadd.f32 %v1065_v39, %v4663_v31  ;;  %v1067_v56 = vpop.f32.mrb[2].mxu0 }
 0x22c   : > { %v1309_v8 = vadd.f32 %v1308_v55, %v4665_v23  ;;  %v1310_v52 = vpop.f32.mrb[2].mxu1  ;;  %v1068_v26 = vadd.f32 %v1067_v56, %v4659_v33  ;;  %v1069_v37 = vpop.f32.mrb[3].mxu0  ;;  %v1515_v41 = vmax.f32 %v1064_v12, 0.0  ;;  %v812_v48 = vpack.c.bf16 %v789_v13, %v788_v40 }
 0x22d   : > { %v1311_v50 = vadd.f32 %v1310_v52, %v4661_v29  ;;  %v1312_v53 = vpop.f32.mrb[3].mxu1  ;;  %v1070_v5 = vadd.f32 %v1069_v37, %v4663_v31  ;;  %v1517_v43 = vmax.f32 %v1307_v1, 0.0  ;;  %v1516_v34 = vmax.f32 %v1066_v2, 0.0  ;;  %v3750_v49 = vpop.eup %3749 }
 0x22e   : > { %v1313_v63 = vadd.f32 %v1312_v53, %v4665_v23  ;;  %v1519_v21 = vmax.f32 %v1068_v26, 0.0  ;;  %v1518_v42 = vmax.f32 %v1309_v8, 0.0  ;;  %1242 = vmatmul.mubr.bf16.gmra.mrb[72].mxu0 %v812_v48  ;;  %1485 = vmatmul.mubr.bf16.gmra.mrb[72].mxu1 %v812_v48  ;;  %v790_v60 = vmul.f32 %v3750_v49, %v4468_v15 }
 0x22f   : > { %v1521_v22 = vmax.f32 %v1311_v50, 0.0  ;;  %v1520_v47 = vmax.f32 %v1070_v5, 0.0  ;;  %1251 = vmatprep.mubr.bf16.mxu0 %v3849_v57  ;;  %1494 = vmatprep.mubr.bf16.mxu1 %v3849_v57 }
 0x230   : > { %v1522_v0 = vmax.f32 %v1313_v63, 0.0  ;;  %v4679_v38 = vpack.c.bf16 %v1519_v21, %v1515_v41 }
 0x231   : > { %v4681_v35 = vpack.c.bf16 %v1521_v22, %v1517_v43  ;;  %v3752_v11 = vpop.eup %3751  ;;  %v4683_v61 = vpack.c.bf16 %v1520_v47, %v1516_v34  ;;  %v1073_v17 = vpop.f32.mrb[4].mxu0 }
 0x232   : > { %v4685_v10 = vpack.c.bf16 %v1522_v0, %v1518_v42  ;;  %v1316_v25 = vpop.f32.mrb[4].mxu1  ;;  %v1074_v24 = vadd.f32 %v1073_v17, %v4659_v33  ;;  %v1075_v36 = vpop.f32.mrb[5].mxu0  ;;  %v791_v28 = vmul.f32 %v3752_v11, %v4476_v18 }
 0x233   : > { %v1317_v4 = vadd.f32 %v1316_v25, %v4661_v29  ;;  %v1318_v30 = vpop.f32.mrb[5].mxu1  ;;  %v1076_v46 = vadd.f32 %v1075_v36, %v4663_v31  ;;  %v1077_v7 = vpop.f32.mrb[6].mxu0 }
 0x234   : > { %v1319_v58 = vadd.f32 %v1318_v30, %v4665_v23  ;;  %v1320_v62 = vpop.f32.mrb[6].mxu1  ;;  %v1078_v20 = vadd.f32 %v1077_v7, %v4659_v33  ;;  %v1079_v9 = vpop.f32.mrb[7].mxu0  ;;  %v1523_v45 = vmax.f32 %v1074_v24, 0.0  ;;  %v813_v59 = vpack.c.bf16 %v791_v28, %v790_v60 }
 0x235   : > { %v1321_v3 = vadd.f32 %v1320_v62, %v4661_v29  ;;  %v1322_v27 = vpop.f32.mrb[7].mxu1  ;;  %v1080_v54 = vadd.f32 %v1079_v9, %v4663_v31  ;;  %v1525_v18 = vmax.f32 %v1317_v4, 0.0  ;;  %v1524_v14 = vmax.f32 %v1076_v46, 0.0 }
 0x236   : > { %v1323_v44 = vadd.f32 %v1322_v27, %v4665_v23  ;;  %v1527_v19 = vmax.f32 %v1078_v20, 0.0  ;;  %v1526_v51 = vmax.f32 %v1319_v58, 0.0  ;;  %1252 = vmatmul.mubr.bf16.gmra.mrb[76].mxu0 %v813_v59  ;;  %1495 = vmatmul.mubr.bf16.gmra.mrb[76].mxu1 %v813_v59 }
 0x237   : > { %v1529_v32 = vmax.f32 %v1321_v3, 0.0  ;;  %v1528_v12 = vmax.f32 %v1080_v54, 0.0  ;;  %1261 = vmatprep.mubr.bf16.mxu0 %v3849_v57  ;;  %1504 = vmatprep.mubr.bf16.mxu1 %v3849_v57 }
 0x238   : > { %v1530_v1 = vmax.f32 %v1323_v44, 0.0  ;;  %v4699_v39 = vpack.c.bf16 %v1527_v19, %v1523_v45 }
 0x239   : > { %v4701_v55 = vpack.c.bf16 %v1529_v32, %v1525_v18  ;;  %v4703_v15 = vpack.c.bf16 %v1528_v12, %v1524_v14  ;;  %v1083_v2 = vpop.f32.mrb[8].mxu0  ;;  %v1326_v8 = vpop.f32.mrb[8].mxu1 }
 0x23a   : > { %v4705_v13 = vpack.c.bf16 %v1530_v1, %v1526_v51  ;;  %v1084_v56 = vadd.f32 %v1083_v2, %v4659_v33  ;;  %v1327_v52 = vadd.f32 %v1326_v8, %v4661_v29  ;;  %v1085_v26 = vpop.f32.mrb[9].mxu0  ;;  %v1328_v50 = vpop.f32.mrb[9].mxu1 }
 0x23b   : > { %v1086_v37 = vadd.f32 %v1085_v26, %v4663_v31  ;;  %v1329_v53 = vadd.f32 %v1328_v50, %v4665_v23  ;;  %v1087_v40 = vpop.f32.mrb[10].mxu0  ;;  %v1330_v41 = vpop.f32.mrb[10].mxu1 }
 0x23c   : > { %v1088_v5 = vadd.f32 %v1087_v40, %v4659_v33  ;;  %v1331_v63 = vadd.f32 %v1330_v41, %v4661_v29  ;;  %v1089_v43 = vpop.f32.mrb[11].mxu0  ;;  %v1332_v21 = vpop.f32.mrb[11].mxu1  ;;  %v1531_v48 = vmax.f32 %v1084_v56, 0.0  ;;  %v1533_v34 = vmax.f32 %v1327_v52, 0.0 }
 0x23d   : > { %v1090_v57 = vadd.f32 %v1089_v43, %v4663_v31  ;;  %v1333_v22 = vadd.f32 %v1332_v21, %v4665_v23  ;;  %v1532_v0 = vmax.f32 %v1086_v37, 0.0  ;;  %v1534_v49 = vmax.f32 %v1329_v53, 0.0 }
 0x23e   : > { %v1535_v42 = vmax.f32 %v1088_v5, 0.0  ;;  %v1537_v47 = vmax.f32 %v1331_v63, 0.0 }
 0x23f   : > { %v1536_v11 = vmax.f32 %v1090_v57, 0.0  ;;  %v1538_v17 = vmax.f32 %v1333_v22, 0.0 }
 0x240   : > { %v4717_v25 = vpack.c.bf16 %v1535_v42, %v1531_v48  ;;  %v4719_v24 = vpack.c.bf16 %v1537_v47, %v1533_v34 }
 0x241   : > { %v4721_v4 = vpack.c.bf16 %v1536_v11, %v1532_v0  ;;  %v4723_v36 = vpack.c.bf16 %v1538_v17, %v1534_v49  ;;  %v1093_v30 = vpop.f32.mrb[12].mxu0  ;;  %v1336_v28 = vpop.f32.mrb[12].mxu1 }
 0x242   : > { %v1094_v46 = vadd.f32 %v1093_v30, %v4659_v33  ;;  %v1337_v58 = vadd.f32 %v1336_v28, %v4661_v29  ;;  %v1095_v7 = vpop.f32.mrb[13].mxu0  ;;  %v1338_v62 = vpop.f32.mrb[13].mxu1 }
 0x243   : > { %v1096_v20 = vadd.f32 %v1095_v7, %v4663_v31  ;;  %v1339_v3 = vadd.f32 %v1338_v62, %v4665_v23  ;;  %v1097_v9 = vpop.f32.mrb[14].mxu0  ;;  %v1340_v27 = vpop.f32.mrb[14].mxu1 }
 0x244   : > { %v1098_v60 = vadd.f32 %v1097_v9, %v4659_v33  ;;  %v1341_v45 = vadd.f32 %v1340_v27, %v4661_v29  ;;  %v1099_v54 = vpop.f32.mrb[15].mxu0  ;;  %v1342_v44 = vpop.f32.mrb[15].mxu1  ;;  %v1539_v32 = vmax.f32 %v1094_v46, 0.0  ;;  %v1541_v59 = vmax.f32 %v1337_v58, 0.0 }
 0x245   : > { %v1100_v18 = vadd.f32 %v1099_v54, %v4663_v31  ;;  %v1343_v19 = vadd.f32 %v1342_v44, %v4665_v23  ;;  %v1540_v12 = vmax.f32 %v1096_v20, 0.0  ;;  %v1542_v1 = vmax.f32 %v1339_v3, 0.0 }
 0x246   : > { %v1543_v14 = vmax.f32 %v1098_v60, 0.0  ;;  %v1545_v51 = vmax.f32 %v1341_v45, 0.0 }
 0x247   : > { %v1544_v2 = vmax.f32 %v1100_v18, 0.0  ;;  %v1546_v8 = vmax.f32 %v1343_v19, 0.0 }
 0x248   : > { %v4733_v56 = vpack.c.bf16 %v1543_v14, %v1539_v32  ;;  %v4735_v52 = vpack.c.bf16 %v1545_v51, %v1541_v59 }
 0x249   : > { %v4737_v26 = vpack.c.bf16 %v1544_v2, %v1540_v12  ;;  %v4739_v50 = vpack.c.bf16 %v1546_v8, %v1542_v1  ;;  %v1103_v37 = vpop.f32.mrb[16].mxu0  ;;  %v1346_v53 = vpop.f32.mrb[16].mxu1 }
 0x24a   : > { %v1104_v40 = vadd.f32 %v1103_v37, %v4659_v33  ;;  %v1347_v41 = vadd.f32 %v1346_v53, %v4661_v29  ;;  %v1105_v5 = vpop.f32.mrb[17].mxu0  ;;  %v1348_v63 = vpop.f32.mrb[17].mxu1 }
 0x24b   : > { %v1106_v43 = vadd.f32 %v1105_v5, %v4663_v31  ;;  %v1349_v21 = vadd.f32 %v1348_v63, %v4665_v23  ;;  %v1107_v57 = vpop.f32.mrb[18].mxu0  ;;  %v1350_v22 = vpop.f32.mrb[18].mxu1 }
 0x24c   : > { %v1108_v48 = vadd.f32 %v1107_v57, %v4659_v33  ;;  %v1351_v34 = vadd.f32 %v1350_v22, %v4661_v29  ;;  %v1109_v42 = vpop.f32.mrb[19].mxu0  ;;  %v1352_v47 = vpop.f32.mrb[19].mxu1  ;;  %v1547_v11 = vmax.f32 %v1104_v40, 0.0  ;;  %v1549_v17 = vmax.f32 %v1347_v41, 0.0 }
 0x24d   : > { %v1110_v0 = vadd.f32 %v1109_v42, %v4663_v31  ;;  %v1353_v49 = vadd.f32 %v1352_v47, %v4665_v23  ;;  %v1548_v46 = vmax.f32 %v1106_v43, 0.0  ;;  %v1550_v58 = vmax.f32 %v1349_v21, 0.0 }
 0x24e   : > { %v1551_v30 = vmax.f32 %v1108_v48, 0.0  ;;  %v1553_v28 = vmax.f32 %v1351_v34, 0.0 }
 0x24f   : > { %v1552_v7 = vmax.f32 %v1110_v0, 0.0  ;;  %v1554_v62 = vmax.f32 %v1353_v49, 0.0 }
 0x250   : > { %v4749_v20 = vpack.c.bf16 %v1551_v30, %v1547_v11  ;;  %v4751_v3 = vpack.c.bf16 %v1553_v28, %v1549_v17 }
 0x251   : > { %v4753_v9 = vpack.c.bf16 %v1552_v7, %v1548_v46  ;;  %v4755_v27 = vpack.c.bf16 %v1554_v62, %v1550_v58  ;;  %v1113_v60 = vpop.f32.mrb[20].mxu0  ;;  %v1356_v45 = vpop.f32.mrb[20].mxu1 }
 0x252   : > { %v1114_v54 = vadd.f32 %v1113_v60, %v4659_v33  ;;  %v1357_v44 = vadd.f32 %v1356_v45, %v4661_v29  ;;  %v1115_v18 = vpop.f32.mrb[21].mxu0  ;;  %v1358_v19 = vpop.f32.mrb[21].mxu1 }
 0x253   : > { %v1116_v32 = vadd.f32 %v1115_v18, %v4663_v31  ;;  %v1359_v59 = vadd.f32 %v1358_v19, %v4665_v23  ;;  %v1117_v14 = vpop.f32.mrb[22].mxu0  ;;  %v1360_v51 = vpop.f32.mrb[22].mxu1 }
 0x254   : > { %v1118_v12 = vadd.f32 %v1117_v14, %v4659_v33  ;;  %v1361_v1 = vadd.f32 %v1360_v51, %v4661_v29  ;;  %v1119_v2 = vpop.f32.mrb[23].mxu0  ;;  %v1362_v8 = vpop.f32.mrb[23].mxu1  ;;  %v1555_v40 = vmax.f32 %v1114_v54, 0.0  ;;  %v1557_v41 = vmax.f32 %v1357_v44, 0.0 }
 0x255   : > { %v1120_v37 = vadd.f32 %v1119_v2, %v4663_v31  ;;  %v1363_v53 = vadd.f32 %v1362_v8, %v4665_v23  ;;  %v1556_v43 = vmax.f32 %v1116_v32, 0.0  ;;  %v1558_v21 = vmax.f32 %v1359_v59, 0.0 }
 0x256   : > { %v1559_v5 = vmax.f32 %v1118_v12, 0.0  ;;  %v1561_v63 = vmax.f32 %v1361_v1, 0.0 }
 0x257   : > { %v1560_v57 = vmax.f32 %v1120_v37, 0.0  ;;  %v1562_v22 = vmax.f32 %v1363_v53, 0.0 }
 0x258   : > { %v4765_v48 = vpack.c.bf16 %v1559_v5, %v1555_v40  ;;  %v4767_v34 = vpack.c.bf16 %v1561_v63, %v1557_v41 }
 0x259   : > { %v4769_v42 = vpack.c.bf16 %v1560_v57, %v1556_v43  ;;  %v4771_v47 = vpack.c.bf16 %v1562_v22, %v1558_v21  ;;  %v1123_v0 = vpop.f32.mrb[24].mxu0  ;;  %v1366_v49 = vpop.f32.mrb[24].mxu1 }
 0x25a   : > { %v1124_v11 = vadd.f32 %v1123_v0, %v4659_v33  ;;  %v1367_v17 = vadd.f32 %v1366_v49, %v4661_v29  ;;  %v1125_v30 = vpop.f32.mrb[25].mxu0  ;;  %v1368_v28 = vpop.f32.mrb[25].mxu1 }
 0x25b   : > { %v1126_v46 = vadd.f32 %v1125_v30, %v4663_v31  ;;  %v1369_v58 = vadd.f32 %v1368_v28, %v4665_v23  ;;  %v1127_v7 = vpop.f32.mrb[26].mxu0  ;;  %v1370_v62 = vpop.f32.mrb[26].mxu1 }
 0x25c   : > { %v1128_v60 = vadd.f32 %v1127_v7, %v4659_v33  ;;  %v1371_v45 = vadd.f32 %v1370_v62, %v4661_v29  ;;  %v1129_v54 = vpop.f32.mrb[27].mxu0  ;;  %v1372_v44 = vpop.f32.mrb[27].mxu1  ;;  %v1563_v32 = vmax.f32 %v1124_v11, 0.0  ;;  %v1565_v59 = vmax.f32 %v1367_v17, 0.0 }
 0x25d   : > { %v1130_v18 = vadd.f32 %v1129_v54, %v4663_v31  ;;  %v1373_v19 = vadd.f32 %v1372_v44, %v4665_v23  ;;  %v1564_v12 = vmax.f32 %v1126_v46, 0.0  ;;  %v1566_v1 = vmax.f32 %v1369_v58, 0.0 }
 0x25e   : > { %v1567_v14 = vmax.f32 %v1128_v60, 0.0  ;;  %v1569_v51 = vmax.f32 %v1371_v45, 0.0 }
 0x25f   : > { %v1568_v2 = vmax.f32 %v1130_v18, 0.0  ;;  %v1570_v8 = vmax.f32 %v1373_v19, 0.0 }
 0x260   : > { %v4781_v37 = vpack.c.bf16 %v1567_v14, %v1563_v32  ;;  %v4783_v53 = vpack.c.bf16 %v1569_v51, %v1565_v59 }
 0x261   : > { %v4785_v40 = vpack.c.bf16 %v1568_v2, %v1564_v12  ;;  %v4787_v41 = vpack.c.bf16 %v1570_v8, %v1566_v1  ;;  %v1133_v5 = vpop.f32.mrb[28].mxu0  ;;  %v1376_v63 = vpop.f32.mrb[28].mxu1 }
 0x262   : > { %v1134_v43 = vadd.f32 %v1133_v5, %v4659_v33  ;;  %v1377_v21 = vadd.f32 %v1376_v63, %v4661_v29  ;;  %v1135_v57 = vpop.f32.mrb[29].mxu0  ;;  %v1378_v22 = vpop.f32.mrb[29].mxu1 }
 0x263   : > { %v1136_v0 = vadd.f32 %v1135_v57, %v4663_v31  ;;  %v1379_v49 = vadd.f32 %v1378_v22, %v4665_v23  ;;  %v1137_v11 = vpop.f32.mrb[30].mxu0  ;;  %v1380_v17 = vpop.f32.mrb[30].mxu1 }
 0x264   : > { %v1138_v30 = vadd.f32 %v1137_v11, %v4659_v33  ;;  %v1381_v28 = vadd.f32 %v1380_v17, %v4661_v29  ;;  %v1139_v46 = vpop.f32.mrb[31].mxu0  ;;  %v1382_v58 = vpop.f32.mrb[31].mxu1  ;;  %v1571_v60 = vmax.f32 %v1134_v43, 0.0  ;;  %v1573_v45 = vmax.f32 %v1377_v21, 0.0 }
 0x265   : > { %v1140_v7 = vadd.f32 %v1139_v46, %v4663_v31  ;;  %v1383_v62 = vadd.f32 %v1382_v58, %v4665_v23  ;;  %v1572_v18 = vmax.f32 %v1136_v0, 0.0  ;;  %v1574_v19 = vmax.f32 %v1379_v49, 0.0 }
 0x266   : > { %v1575_v54 = vmax.f32 %v1138_v30, 0.0  ;;  %v1577_v44 = vmax.f32 %v1381_v28, 0.0 }
 0x267   : > { %v1576_v32 = vmax.f32 %v1140_v7, 0.0  ;;  %v1578_v59 = vmax.f32 %v1383_v62, 0.0 }
 0x268   : > { %v4797_v14 = vpack.c.bf16 %v1575_v54, %v1571_v60  ;;  %v4799_v51 = vpack.c.bf16 %v1577_v44, %v1573_v45 }
 0x269   : > { %v4801_v12 = vpack.c.bf16 %v1576_v32, %v1572_v18  ;;  %v4803_v1 = vpack.c.bf16 %v1578_v59, %v1574_v19  ;;  %v1143_v2 = vpop.f32.mrb[32].mxu0  ;;  %v1386_v8 = vpop.f32.mrb[32].mxu1 }
 0x26a   : > { %v1144_v5 = vadd.f32 %v1143_v2, %v4659_v33  ;;  %v1387_v63 = vadd.f32 %v1386_v8, %v4661_v29  ;;  %v1145_v43 = vpop.f32.mrb[33].mxu0  ;;  %v1388_v21 = vpop.f32.mrb[33].mxu1 }
 0x26b   : > { %v1146_v57 = vadd.f32 %v1145_v43, %v4663_v31  ;;  %v1389_v22 = vadd.f32 %v1388_v21, %v4665_v23  ;;  %v1147_v0 = vpop.f32.mrb[34].mxu0  ;;  %v1390_v49 = vpop.f32.mrb[34].mxu1 }
 0x26c   : > { %v1148_v11 = vadd.f32 %v1147_v0, %v4659_v33  ;;  %v1391_v17 = vadd.f32 %v1390_v49, %v4661_v29  ;;  %v1149_v30 = vpop.f32.mrb[35].mxu0  ;;  %v1392_v28 = vpop.f32.mrb[35].mxu1  ;;  %v1579_v46 = vmax.f32 %v1144_v5, 0.0  ;;  %v1581_v62 = vmax.f32 %v1387_v63, 0.0 }
 0x26d   : > { %v1150_v58 = vadd.f32 %v1149_v30, %v4663_v31  ;;  %v1393_v7 = vadd.f32 %v1392_v28, %v4665_v23  ;;  %v1580_v60 = vmax.f32 %v1146_v57, 0.0  ;;  %v1582_v18 = vmax.f32 %v1389_v22, 0.0 }
 0x26e   : > { %v1583_v45 = vmax.f32 %v1148_v11, 0.0  ;;  %v1585_v54 = vmax.f32 %v1391_v17, 0.0  ;;  %v623_v44 = vpop.xlane.xlu0 %622 }
 0x26f   : > { %v1584_v19 = vmax.f32 %v1150_v58, 0.0  ;;  %v1586_v32 = vmax.f32 %v1393_v7, 0.0  ;;  %v666_v59 = vmul.f32 0.0078125, %v623_v44 }
 0x270   : > { %v4813_v2 = vpack.c.bf16 %v1583_v45, %v1579_v46  ;;  %v4815_v8 = vpack.c.bf16 %v1585_v54, %v1581_v62 }
 0x271   : > { %v4817_v43 = vpack.c.bf16 %v1584_v19, %v1580_v60  ;;  %v4819_v5 = vpack.c.bf16 %v1586_v32, %v1582_v18  ;;  %v708_v21 = vadd.f32 1e-05, %v666_v59  ;;  %v1153_v0 = vpop.f32.mrb[36].mxu0  ;;  %v1396_v49 = vpop.f32.mrb[36].mxu1 }
 0x272   : > { %5251 = vst [vmem:[#allocation3_spill] sm:$0xff] %v4815_v8  ;;  %v1154_v63 = vadd.f32 %v1153_v0, %v4659_v33  ;;  %v1397_v57 = vadd.f32 %v1396_v49, %v4661_v29  ;;  %v625_v11 = vpop.xlane.xlu1 %624  ;;  %v1155_v22 = vpop.f32.mrb[37].mxu0 }
 0x273   : > { %v667_v17 = vmul.f32 0.0078125, %v625_v11  ;;  %v1156_v30 = vadd.f32 %v1155_v22, %v4663_v31  ;;  %v1398_v28 = vpop.f32.mrb[37].mxu1  ;;  %v1157_v46 = vpop.f32.mrb[38].mxu0  ;;  %3753 = vrsqrt.f32 %v708_v21 }
 0x274   : > { %v1399_v58 = vadd.f32 %v1398_v28, %v4665_v23  ;;  %v1158_v7 = vadd.f32 %v1157_v46, %v4659_v33  ;;  %v1400_v62 = vpop.f32.mrb[38].mxu1  ;;  %v1159_v60 = vpop.f32.mrb[39].mxu0  ;;  %v1587_v19 = vmax.f32 %v1154_v63, 0.0  ;;  %v1589_v32 = vmax.f32 %v1397_v57, 0.0 }
 0x275   : > { %v709_v45 = vadd.f32 1e-05, %v667_v17  ;;  %v1401_v54 = vadd.f32 %v1400_v62, %v4661_v29  ;;  %v1160_v44 = vadd.f32 %v1159_v60, %v4663_v31  ;;  %v1402_v18 = vpop.f32.mrb[39].mxu1  ;;  %v1588_v49 = vmax.f32 %v1156_v30, 0.0 }
 0x276   : > { %v1591_v59 = vmax.f32 %v1158_v7, 0.0  ;;  %v1403_v0 = vadd.f32 %v1402_v18, %v4665_v23  ;;  %v1590_v28 = vmax.f32 %v1399_v58, 0.0 }
 0x277   : > { %3755 = vrsqrt.f32 %v709_v45  ;;  %v1593_v11 = vmax.f32 %v1401_v54, 0.0  ;;  %v1592_v22 = vmax.f32 %v1160_v44, 0.0 }
 0x278   : > { %v4829_v46 = vpack.c.bf16 %v1591_v59, %v1587_v19  ;;  %v1594_v8 = vmax.f32 %v1403_v0, 0.0 }
 0x279   : > { %v4831_v21 = vpack.c.bf16 %v1593_v11, %v1589_v32  ;;  %v4833_v17 = vpack.c.bf16 %v1592_v22, %v1588_v49  ;;  %v5252_v22 = vld [vmem:[#allocation3_spill] sm:$0xff] }
 0x27a   : > { %v4835_v62 = vpack.c.bf16 %v1594_v8, %v1590_v28 }
 0x27d   : > { %v3754_v60 = vpop.eup %3753 }
 0x27e   : > { %v792_v57 = vmul.f32 %v3754_v60, %v4538_v16 }
 0x281   : > { %v3756_v63 = vpop.eup %3755 }
 0x282   : > { %v793_v7 = vmul.f32 %v3756_v63, %v4547_v6 }
 0x284   : > { %v814_v45 = vpack.c.bf16 %v793_v7, %v792_v57 }
 0x286   : > { %1262 = vmatmul.mubr.bf16.gmra.mrb[80].mxu0 %v814_v45  ;;  %1505 = vmatmul.mubr.bf16.gmra.mrb[80].mxu1 %v814_v45 }
 0x287   : > { %2062 = vmatprep.mubr.bf16.mxu1 %v4683_v61  ;;  %2263 = vmatprep.mubr.bf16.mxu0 %v4685_v10 }
 0x28e   : > { %2063 = vmatmul.mubr.bf16.vlgmr.msra.gmra.mrb[84].mxu1 %v4679_v38  ;;  %2264 = vmatmul.mubr.bf16.vlgmr.msra.gmra.mrb[84].mxu0 %v4681_v35 }
 0x28f   : > { %2070 = vmatprep.mubr.bf16.mxu1 %v4703_v15  ;;  %2271 = vmatprep.mubr.bf16.mxu0 %v4705_v13 }
 0x296   : > { %2071 = vmatmul.mubr.bf16.gmra.mrb[88].mxu1 %v4699_v39  ;;  %2272 = vmatmul.mubr.bf16.gmra.mrb[88].mxu0 %v4701_v55 }
 0x297   : > { %2078 = vmatprep.mubr.bf16.mxu1 %v4721_v4  ;;  %2279 = vmatprep.mubr.bf16.mxu0 %v4723_v36 }
 0x29e   : > { %2079 = vmatmul.mubr.bf16.gmra.mrb[92].mxu1 %v4717_v25  ;;  %2280 = vmatmul.mubr.bf16.gmra.mrb[92].mxu0 %v4719_v24 }
 0x29f   : > { %2086 = vmatprep.mubr.bf16.mxu1 %v4737_v26  ;;  %2287 = vmatprep.mubr.bf16.mxu0 %v4739_v50 }
 0x2a6   : > { %2087 = vmatmul.mubr.bf16.gmra.mrb[96].mxu1 %v4733_v56  ;;  %2288 = vmatmul.mubr.bf16.gmra.mrb[96].mxu0 %v4735_v52 }
 0x2a7   : > { %2094 = vmatprep.mubr.bf16.mxu1 %v4753_v9  ;;  %2295 = vmatprep.mubr.bf16.mxu0 %v4755_v27 }
 0x2ae   : > { %2095 = vmatmul.mubr.bf16.gmra.mrb[100].mxu1 %v4749_v20  ;;  %2296 = vmatmul.mubr.bf16.gmra.mrb[100].mxu0 %v4751_v3 }
 0x2af   : > { %2102 = vmatprep.mubr.bf16.mxu1 %v4769_v42  ;;  %2303 = vmatprep.mubr.bf16.mxu0 %v4771_v47 }
 0x2b6   : > { %2103 = vmatmul.mubr.bf16.gmra.mrb[104].mxu1 %v4765_v48  ;;  %2304 = vmatmul.mubr.bf16.gmra.mrb[104].mxu0 %v4767_v34 }
 0x2b7   : > { %2110 = vmatprep.mubr.bf16.mxu1 %v4785_v40  ;;  %2311 = vmatprep.mubr.bf16.mxu0 %v4787_v41 }
 0x2be   : > { %2111 = vmatmul.mubr.bf16.gmra.mrb[108].mxu1 %v4781_v37  ;;  %2312 = vmatmul.mubr.bf16.gmra.mrb[108].mxu0 %v4783_v53 }
 0x2bf   : > { %2118 = vmatprep.mubr.bf16.mxu1 %v4801_v12  ;;  %2319 = vmatprep.mubr.bf16.mxu0 %v4803_v1 }
 0x2c1   : > { %v1163_v16 = vpop.f32.mrb[40].mxu0  ;;  %v1406_v6 = vpop.f32.mrb[40].mxu1 }
 0x2c2   : > { %v1164_v38 = vadd.f32 %v1163_v16, %v4659_v33  ;;  %v1407_v35 = vadd.f32 %v1406_v6, %v4661_v29  ;;  %v1165_v61 = vpop.f32.mrb[41].mxu0  ;;  %v1408_v10 = vpop.f32.mrb[41].mxu1 }
 0x2c3   : > { %v1166_v39 = vadd.f32 %v1165_v61, %v4663_v31  ;;  %v1409_v55 = vadd.f32 %v1408_v10, %v4665_v23  ;;  %v1167_v15 = vpop.f32.mrb[42].mxu0  ;;  %v1410_v13 = vpop.f32.mrb[42].mxu1 }
 0x2c4   : > { %v1168_v25 = vadd.f32 %v1167_v15, %v4659_v33  ;;  %v1411_v24 = vadd.f32 %v1410_v13, %v4661_v29  ;;  %v1169_v4 = vpop.f32.mrb[43].mxu0  ;;  %v1412_v36 = vpop.f32.mrb[43].mxu1  ;;  %v1595_v26 = vmax.f32 %v1164_v38, 0.0  ;;  %v1597_v50 = vmax.f32 %v1407_v35, 0.0 }
 0x2c5   : > { %v1170_v56 = vadd.f32 %v1169_v4, %v4663_v31  ;;  %v1413_v52 = vadd.f32 %v1412_v36, %v4665_v23  ;;  %v1596_v9 = vmax.f32 %v1166_v39, 0.0  ;;  %v1598_v27 = vmax.f32 %v1409_v55, 0.0 }
 0x2c6   : > { %v1599_v20 = vmax.f32 %v1168_v25, 0.0  ;;  %v1601_v3 = vmax.f32 %v1411_v24, 0.0  ;;  %2119 = vmatmul.mubr.bf16.gmra.mrb[112].mxu1 %v4797_v14  ;;  %2320 = vmatmul.mubr.bf16.gmra.mrb[112].mxu0 %v4799_v51 }
 0x2c7   : > { %v1600_v48 = vmax.f32 %v1170_v56, 0.0  ;;  %v1602_v34 = vmax.f32 %v1413_v52, 0.0  ;;  %2126 = vmatprep.mubr.bf16.mxu1 %v4817_v43  ;;  %2327 = vmatprep.mubr.bf16.mxu0 %v4819_v5 }
 0x2c8   : > { %v4881_v42 = vpack.c.bf16 %v1599_v20, %v1595_v26  ;;  %v4883_v47 = vpack.c.bf16 %v1601_v3, %v1597_v50 }
 0x2c9   : > { %v1724_v37 = vpack.c.bf16 %v1600_v48, %v1596_v9  ;;  %v1726_v53 = vpack.c.bf16 %v1602_v34, %v1598_v27  ;;  %v1173_v40 = vpop.f32.mrb[44].mxu0  ;;  %v1416_v41 = vpop.f32.mrb[44].mxu1 }
 0x2ca   : > { %v1174_v14 = vadd.f32 %v1173_v40, %v4659_v33  ;;  %v1417_v51 = vadd.f32 %v1416_v41, %v4661_v29  ;;  %v1175_v12 = vpop.f32.mrb[45].mxu0  ;;  %v1418_v1 = vpop.f32.mrb[45].mxu1 }
 0x2cb   : > { %v1176_v8 = vadd.f32 %v1175_v12, %v4663_v31  ;;  %v1419_v43 = vadd.f32 %v1418_v1, %v4665_v23  ;;  %v1177_v30 = vpop.f32.mrb[46].mxu0  ;;  %v1420_v5 = vpop.f32.mrb[46].mxu1 }
 0x2cc   : > { %v1178_v58 = vadd.f32 %v1177_v30, %v4659_v33  ;;  %v1421_v54 = vadd.f32 %v1420_v5, %v4661_v29  ;;  %v1179_v44 = vpop.f32.mrb[47].mxu0  ;;  %v1422_v18 = vpop.f32.mrb[47].mxu1  ;;  %v1603_v59 = vmax.f32 %v1174_v14, 0.0  ;;  %v1605_v0 = vmax.f32 %v1417_v51, 0.0 }
 0x2cd   : > { %v1180_v19 = vadd.f32 %v1179_v44, %v4663_v31  ;;  %v1423_v32 = vadd.f32 %v1422_v18, %v4665_v23  ;;  %v1604_v28 = vmax.f32 %v1176_v8, 0.0  ;;  %v1606_v60 = vmax.f32 %v1419_v43, 0.0 }
 0x2ce   : > { %v1607_v49 = vmax.f32 %v1178_v58, 0.0  ;;  %v1609_v11 = vmax.f32 %v1421_v54, 0.0  ;;  %2127 = vmatmul.mubr.bf16.gmra.mrb[116].mxu1 %v4813_v2  ;;  %2328 = vmatmul.mubr.bf16.gmra.mrb[116].mxu0 %v5252_v22 }
 0x2cf   : > { %v1608_v63 = vmax.f32 %v1180_v19, 0.0  ;;  %v1610_v57 = vmax.f32 %v1423_v32, 0.0  ;;  %2134 = vmatprep.mubr.bf16.mxu1 %v4833_v17  ;;  %2335 = vmatprep.mubr.bf16.mxu0 %v4835_v62 }
 0x2d0   : > { %v4897_v7 = vpack.c.bf16 %v1607_v49, %v1603_v59  ;;  %v4899_v45 = vpack.c.bf16 %v1609_v11, %v1605_v0 }
 0x2d1   : > { %v1728_v16 = vpack.c.bf16 %v1608_v63, %v1604_v28  ;;  %v1730_v6 = vpack.c.bf16 %v1610_v57, %v1606_v60  ;;  %v1183_v38 = vpop.f32.mrb[48].mxu0  ;;  %v1426_v35 = vpop.f32.mrb[48].mxu1 }
 0x2d2   : > { %v1184_v2 = vadd.f32 %v1183_v38, %v4659_v33  ;;  %v1427_v61 = vadd.f32 %v1426_v35, %v4661_v29  ;;  %v1185_v10 = vpop.f32.mrb[49].mxu0  ;;  %v1428_v39 = vpop.f32.mrb[49].mxu1 }
 0x2d3   : > { %v1186_v55 = vadd.f32 %v1185_v10, %v4663_v31  ;;  %v1429_v17 = vadd.f32 %v1428_v39, %v4665_v23  ;;  %v1187_v15 = vpop.f32.mrb[50].mxu0  ;;  %v1430_v62 = vpop.f32.mrb[50].mxu1 }
 0x2d4   : > { %v1188_v13 = vadd.f32 %v1187_v15, %v4659_v33  ;;  %v1431_v25 = vadd.f32 %v1430_v62, %v4661_v29  ;;  %v1189_v24 = vpop.f32.mrb[51].mxu0  ;;  %v1432_v4 = vpop.f32.mrb[51].mxu1  ;;  %v1611_v52 = vmax.f32 %v1184_v2, 0.0  ;;  %v1613_v26 = vmax.f32 %v1427_v61, 0.0 }
 0x2d5   : > { %v1190_v36 = vadd.f32 %v1189_v24, %v4663_v31  ;;  %v1433_v56 = vadd.f32 %v1432_v4, %v4665_v23  ;;  %v1612_v3 = vmax.f32 %v1186_v55, 0.0  ;;  %v1614_v9 = vmax.f32 %v1429_v17, 0.0 }
 0x2d6   : > { %v1615_v50 = vmax.f32 %v1188_v13, 0.0  ;;  %v1617_v20 = vmax.f32 %v1431_v25, 0.0  ;;  %2135 = vmatmul.mubr.bf16.gmra.mrb[120].mxu1 %v4829_v46  ;;  %2336 = vmatmul.mubr.bf16.gmra.mrb[120].mxu0 %v4831_v21 }
 0x2d7   : > { %v1616_v27 = vmax.f32 %v1190_v36, 0.0  ;;  %v1618_v48 = vmax.f32 %v1433_v56, 0.0  ;;  %2142 = vmatprep.mubr.bf16.mxu1 %v1724_v37  ;;  %2343 = vmatprep.mubr.bf16.mxu0 %v1726_v53 }
 0x2d8   : > { %v4911_v34 = vpack.c.bf16 %v1615_v50, %v1611_v52  ;;  %v4913_v40 = vpack.c.bf16 %v1617_v20, %v1613_v26 }
 0x2d9   : > { %v1732_v41 = vpack.c.bf16 %v1616_v27, %v1612_v3  ;;  %v1734_v14 = vpack.c.bf16 %v1618_v48, %v1614_v9  ;;  %v1193_v51 = vpop.f32.mrb[52].mxu0  ;;  %v1436_v12 = vpop.f32.mrb[52].mxu1 }
 0x2da   : > { %v1194_v1 = vadd.f32 %v1193_v51, %v4659_v33  ;;  %v1437_v46 = vadd.f32 %v1436_v12, %v4661_v29  ;;  %v1195_v8 = vpop.f32.mrb[53].mxu0  ;;  %v1438_v21 = vpop.f32.mrb[53].mxu1 }
 0x2db   : > { %v1196_v43 = vadd.f32 %v1195_v8, %v4663_v31  ;;  %v1439_v30 = vadd.f32 %v1438_v21, %v4665_v23  ;;  %v1197_v37 = vpop.f32.mrb[54].mxu0  ;;  %v1440_v53 = vpop.f32.mrb[54].mxu1 }
 0x2dc   : > { %v1198_v5 = vadd.f32 %v1197_v37, %v4659_v33  ;;  %v1441_v58 = vadd.f32 %v1440_v53, %v4661_v29  ;;  %v1199_v54 = vpop.f32.mrb[55].mxu0  ;;  %v1442_v44 = vpop.f32.mrb[55].mxu1  ;;  %v1619_v32 = vmax.f32 %v1194_v1, 0.0  ;;  %v1621_v59 = vmax.f32 %v1437_v46, 0.0 }
 0x2dd   : > { %v1200_v18 = vadd.f32 %v1199_v54, %v4663_v31  ;;  %v1443_v19 = vadd.f32 %v1442_v44, %v4665_v23  ;;  %v1620_v11 = vmax.f32 %v1196_v43, 0.0  ;;  %v1622_v22 = vmax.f32 %v1439_v30, 0.0 }
 0x2de   : > { %v1623_v0 = vmax.f32 %v1198_v5, 0.0  ;;  %v1625_v49 = vmax.f32 %v1441_v58, 0.0  ;;  %2143 = vmatmul.mubr.bf16.gmra.mrb[124].mxu1 %v4881_v42  ;;  %2344 = vmatmul.mubr.bf16.gmra.mrb[124].mxu0 %v4883_v47 }
 0x2df   : > { %v1624_v28 = vmax.f32 %v1200_v18, 0.0  ;;  %v1626_v60 = vmax.f32 %v1443_v19, 0.0  ;;  %2150 = vmatprep.mubr.bf16.mxu1 %v1728_v16  ;;  %2351 = vmatprep.mubr.bf16.mxu0 %v1730_v6 }
 0x2e0   : > { %v4925_v63 = vpack.c.bf16 %v1623_v0, %v1619_v32  ;;  %v4927_v57 = vpack.c.bf16 %v1625_v49, %v1621_v59 }
 0x2e1   : > { %v1736_v38 = vpack.c.bf16 %v1624_v28, %v1620_v11  ;;  %v1738_v35 = vpack.c.bf16 %v1626_v60, %v1622_v22  ;;  %v1203_v2 = vpop.f32.mrb[56].mxu0  ;;  %v1446_v61 = vpop.f32.mrb[56].mxu1 }
 0x2e2   : > { %v1204_v10 = vadd.f32 %v1203_v2, %v4659_v33  ;;  %v1447_v42 = vadd.f32 %v1446_v61, %v4661_v29  ;;  %v1205_v39 = vpop.f32.mrb[57].mxu0  ;;  %v1448_v47 = vpop.f32.mrb[57].mxu1 }
 0x2e3   : > { %v1206_v55 = vadd.f32 %v1205_v39, %v4663_v31  ;;  %v1449_v17 = vadd.f32 %v1448_v47, %v4665_v23  ;;  %v1207_v16 = vpop.f32.mrb[58].mxu0  ;;  %v1450_v6 = vpop.f32.mrb[58].mxu1 }
 0x2e4   : > { %v1208_v15 = vadd.f32 %v1207_v16, %v4659_v33  ;;  %v1451_v62 = vadd.f32 %v1450_v6, %v4661_v29  ;;  %v1209_v13 = vpop.f32.mrb[59].mxu0  ;;  %v1452_v25 = vpop.f32.mrb[59].mxu1  ;;  %v1627_v36 = vmax.f32 %v1204_v10, 0.0  ;;  %v1629_v56 = vmax.f32 %v1447_v42, 0.0 }
 0x2e5   : > { %v1210_v24 = vadd.f32 %v1209_v13, %v4663_v31  ;;  %v1453_v4 = vadd.f32 %v1452_v25, %v4665_v23  ;;  %v1628_v50 = vmax.f32 %v1206_v55, 0.0  ;;  %v1630_v20 = vmax.f32 %v1449_v17, 0.0 }
 0x2e6   : > { %v1631_v52 = vmax.f32 %v1208_v15, 0.0  ;;  %v1633_v26 = vmax.f32 %v1451_v62, 0.0  ;;  %2151 = vmatmul.mubr.bf16.gmra.mrb[128].mxu1 %v4897_v7  ;;  %2352 = vmatmul.mubr.bf16.gmra.mrb[128].mxu0 %v4899_v45 }
 0x2e7   : > { %v1632_v3 = vmax.f32 %v1210_v24, 0.0  ;;  %v1634_v9 = vmax.f32 %v1453_v4, 0.0  ;;  %2158 = vmatprep.mubr.bf16.mxu1 %v1732_v41  ;;  %2359 = vmatprep.mubr.bf16.mxu0 %v1734_v14 }
 0x2e8   : > { %v4939_v27 = vpack.c.bf16 %v1631_v52, %v1627_v36  ;;  %v4941_v48 = vpack.c.bf16 %v1633_v26, %v1629_v56 }
 0x2e9   : > { %v1740_v51 = vpack.c.bf16 %v1632_v3, %v1628_v50  ;;  %v1742_v12 = vpack.c.bf16 %v1634_v9, %v1630_v20  ;;  %v1213_v1 = vpop.f32.mrb[60].mxu0  ;;  %v1456_v46 = vpop.f32.mrb[60].mxu1 }
 0x2ea   : > { %v1214_v8 = vadd.f32 %v1213_v1, %v4659_v33  ;;  %v1457_v7 = vadd.f32 %v1456_v46, %v4661_v29  ;;  %v1215_v21 = vpop.f32.mrb[61].mxu0  ;;  %v1458_v45 = vpop.f32.mrb[61].mxu1 }
 0x2eb   : > { %v1216_v43 = vadd.f32 %v1215_v21, %v4663_v31  ;;  %v1459_v30 = vadd.f32 %v1458_v45, %v4665_v23  ;;  %v1217_v41 = vpop.f32.mrb[62].mxu0  ;;  %v1460_v14 = vpop.f32.mrb[62].mxu1 }
 0x2ec   : > { %v1218_v37 = vadd.f32 %v1217_v41, %v4659_v33  ;;  %v1461_v53 = vadd.f32 %v1460_v14, %v4661_v29  ;;  %v1219_v5 = vpop.f32.mrb[63].mxu0  ;;  %v1462_v58 = vpop.f32.mrb[63].mxu1  ;;  %v1635_v18 = vmax.f32 %v1214_v8, 0.0  ;;  %v1637_v19 = vmax.f32 %v1457_v7, 0.0 }
 0x2ed   : > { %v1220_v54 = vadd.f32 %v1219_v5, %v4663_v31  ;;  %v1463_v44 = vadd.f32 %v1462_v58, %v4665_v23  ;;  %v1636_v0 = vmax.f32 %v1216_v43, 0.0  ;;  %v1638_v49 = vmax.f32 %v1459_v30, 0.0 }
 0x2ee   : > { %v1639_v32 = vmax.f32 %v1218_v37, 0.0  ;;  %v1641_v59 = vmax.f32 %v1461_v53, 0.0  ;;  %2159 = vmatmul.mubr.bf16.gmra.mrb[132].mxu1 %v4911_v34  ;;  %2360 = vmatmul.mubr.bf16.gmra.mrb[132].mxu0 %v4913_v40 }
 0x2ef   : > { %v1640_v11 = vmax.f32 %v1220_v54, 0.0  ;;  %v1642_v22 = vmax.f32 %v1463_v44, 0.0  ;;  %2166 = vmatprep.mubr.bf16.mxu1 %v1736_v38  ;;  %2367 = vmatprep.mubr.bf16.mxu0 %v1738_v35 }
 0x2f0   : > { %v4953_v28 = vpack.c.bf16 %v1639_v32, %v1635_v18  ;;  %v4955_v60 = vpack.c.bf16 %v1641_v59, %v1637_v19 }
 0x2f1   : > { %v1744_v2 = vpack.c.bf16 %v1640_v11, %v1636_v0  ;;  %v1746_v61 = vpack.c.bf16 %v1642_v22, %v1638_v49  ;;  %v1223_v10 = vpop.f32.mrb[64].mxu0  ;;  %v1466_v42 = vpop.f32.mrb[64].mxu1 }
 0x2f2   : > { %v1224_v39 = vadd.f32 %v1223_v10, %v4659_v33  ;;  %v1467_v34 = vadd.f32 %v1466_v42, %v4661_v29  ;;  %v1225_v47 = vpop.f32.mrb[65].mxu0  ;;  %v1468_v40 = vpop.f32.mrb[65].mxu1 }
 0x2f3   : > { %v1226_v55 = vadd.f32 %v1225_v47, %v4663_v31  ;;  %v1469_v17 = vadd.f32 %v1468_v40, %v4665_v23  ;;  %v1227_v38 = vpop.f32.mrb[66].mxu0  ;;  %v1470_v35 = vpop.f32.mrb[66].mxu1 }
 0x2f4   : > { %v1228_v16 = vadd.f32 %v1227_v38, %v4659_v33  ;;  %v1471_v6 = vadd.f32 %v1470_v35, %v4661_v29  ;;  %v1229_v15 = vpop.f32.mrb[67].mxu0  ;;  %v1472_v62 = vpop.f32.mrb[67].mxu1  ;;  %v1643_v24 = vmax.f32 %v1224_v39, 0.0  ;;  %v1645_v4 = vmax.f32 %v1467_v34, 0.0 }
 0x2f5   : > { %v1230_v13 = vadd.f32 %v1229_v15, %v4663_v31  ;;  %v1473_v25 = vadd.f32 %v1472_v62, %v4665_v23  ;;  %v1644_v52 = vmax.f32 %v1226_v55, 0.0  ;;  %v1646_v26 = vmax.f32 %v1469_v17, 0.0 }
 0x2f6   : > { %v1647_v36 = vmax.f32 %v1228_v16, 0.0  ;;  %v1649_v56 = vmax.f32 %v1471_v6, 0.0  ;;  %2167 = vmatmul.mubr.bf16.gmra.mrb[136].mxu1 %v4925_v63  ;;  %2368 = vmatmul.mubr.bf16.gmra.mrb[136].mxu0 %v4927_v57 }
 0x2f7   : > { %v1648_v50 = vmax.f32 %v1230_v13, 0.0  ;;  %v1650_v20 = vmax.f32 %v1473_v25, 0.0  ;;  %2174 = vmatprep.mubr.bf16.mxu1 %v1740_v51  ;;  %2375 = vmatprep.mubr.bf16.mxu0 %v1742_v12 }
 0x2f8   : > { %v4967_v3 = vpack.c.bf16 %v1647_v36, %v1643_v24  ;;  %v4969_v9 = vpack.c.bf16 %v1649_v56, %v1645_v4 }
 0x2f9   : > { %v1748_v1 = vpack.c.bf16 %v1648_v50, %v1644_v52  ;;  %v1750_v46 = vpack.c.bf16 %v1650_v20, %v1646_v26  ;;  %v1233_v8 = vpop.f32.mrb[68].mxu0  ;;  %v1476_v7 = vpop.f32.mrb[68].mxu1 }
 0x2fa   : > { %v1234_v21 = vadd.f32 %v1233_v8, %v4659_v33  ;;  %v1477_v63 = vadd.f32 %v1476_v7, %v4661_v29  ;;  %v1235_v45 = vpop.f32.mrb[69].mxu0  ;;  %v1478_v57 = vpop.f32.mrb[69].mxu1 }
 0x2fb   : > { %v1236_v43 = vadd.f32 %v1235_v45, %v4663_v31  ;;  %v1479_v30 = vadd.f32 %v1478_v57, %v4665_v23  ;;  %v1237_v51 = vpop.f32.mrb[70].mxu0  ;;  %v1480_v12 = vpop.f32.mrb[70].mxu1 }
 0x2fc   : > { %v1238_v41 = vadd.f32 %v1237_v51, %v4659_v33  ;;  %v1481_v14 = vadd.f32 %v1480_v12, %v4661_v29  ;;  %v1239_v37 = vpop.f32.mrb[71].mxu0  ;;  %v1482_v53 = vpop.f32.mrb[71].mxu1  ;;  %v1651_v54 = vmax.f32 %v1234_v21, 0.0  ;;  %v1653_v44 = vmax.f32 %v1477_v63, 0.0 }
 0x2fd   : > { %v1240_v5 = vadd.f32 %v1239_v37, %v4663_v31  ;;  %v1483_v58 = vadd.f32 %v1482_v53, %v4665_v23  ;;  %v1652_v32 = vmax.f32 %v1236_v43, 0.0  ;;  %v1654_v59 = vmax.f32 %v1479_v30, 0.0 }
 0x2fe   : > { %v1655_v18 = vmax.f32 %v1238_v41, 0.0  ;;  %v1657_v19 = vmax.f32 %v1481_v14, 0.0  ;;  %2175 = vmatmul.mubr.bf16.gmra.mrb[140].mxu1 %v4939_v27  ;;  %2376 = vmatmul.mubr.bf16.gmra.mrb[140].mxu0 %v4941_v48 }
 0x2ff   : > { %v1656_v0 = vmax.f32 %v1240_v5, 0.0  ;;  %v1658_v49 = vmax.f32 %v1483_v58, 0.0  ;;  %2182 = vmatprep.mubr.bf16.mxu1 %v1744_v2  ;;  %2383 = vmatprep.mubr.bf16.mxu0 %v1746_v61 }
 0x300   : > { %v4981_v11 = vpack.c.bf16 %v1655_v18, %v1651_v54  ;;  %v4983_v22 = vpack.c.bf16 %v1657_v19, %v1653_v44 }
 0x301   : > { %v1752_v10 = vpack.c.bf16 %v1656_v0, %v1652_v32  ;;  %v1754_v42 = vpack.c.bf16 %v1658_v49, %v1654_v59  ;;  %v1243_v39 = vpop.f32.mrb[72].mxu0  ;;  %v1486_v34 = vpop.f32.mrb[72].mxu1 }
 0x302   : > { %v1244_v47 = vadd.f32 %v1243_v39, %v4659_v33  ;;  %v1487_v27 = vadd.f32 %v1486_v34, %v4661_v29  ;;  %v1245_v40 = vpop.f32.mrb[73].mxu0  ;;  %v1488_v48 = vpop.f32.mrb[73].mxu1 }
 0x303   : > { %v1246_v55 = vadd.f32 %v1245_v40, %v4663_v31  ;;  %v1489_v17 = vadd.f32 %v1488_v48, %v4665_v23  ;;  %v1247_v2 = vpop.f32.mrb[74].mxu0  ;;  %v1490_v61 = vpop.f32.mrb[74].mxu1 }
 0x304   : > { %v1248_v38 = vadd.f32 %v1247_v2, %v4659_v33  ;;  %v1491_v35 = vadd.f32 %v1490_v61, %v4661_v29  ;;  %v1249_v16 = vpop.f32.mrb[75].mxu0  ;;  %v1492_v6 = vpop.f32.mrb[75].mxu1  ;;  %v1659_v13 = vmax.f32 %v1244_v47, 0.0  ;;  %v1661_v25 = vmax.f32 %v1487_v27, 0.0 }
 0x305   : > { %v1250_v15 = vadd.f32 %v1249_v16, %v4663_v31  ;;  %v1493_v62 = vadd.f32 %v1492_v6, %v4665_v23  ;;  %v1660_v36 = vmax.f32 %v1246_v55, 0.0  ;;  %v1662_v56 = vmax.f32 %v1489_v17, 0.0 }
 0x306   : > { %2183 = vmatmul.mubr.bf16.gmra.mrb[144].mxu1 %v4953_v28  ;;  %2384 = vmatmul.mubr.bf16.gmra.mrb[144].mxu0 %v4955_v60  ;;  %v1663_v24 = vmax.f32 %v1248_v38, 0.0  ;;  %v1665_v4 = vmax.f32 %v1491_v35, 0.0 }
 0x307   : > { %2190 = vmatprep.mubr.bf16.mxu1 %v1748_v1  ;;  %2391 = vmatprep.mubr.bf16.mxu0 %v1750_v46  ;;  %v1664_v52 = vmax.f32 %v1250_v15, 0.0  ;;  %v1666_v26 = vmax.f32 %v1493_v62, 0.0 }
 0x308   : > { %v1755_v50 = vpack.c.bf16 %v1663_v24, %v1659_v13  ;;  %v1757_v20 = vpack.c.bf16 %v1665_v4, %v1661_v25 }
 0x309   : > { %v1756_v8 = vpack.c.bf16 %v1664_v52, %v1660_v36  ;;  %v1758_v28 = vpack.c.bf16 %v1666_v26, %v1662_v56  ;;  %v1253_v7 = vpop.f32.mrb[76].mxu0  ;;  %v1496_v60 = vpop.f32.mrb[76].mxu1 }
 0x30a   : > { %v1254_v21 = vadd.f32 %v1253_v7, %v4659_v33  ;;  %v1497_v63 = vadd.f32 %v1496_v60, %v4661_v29  ;;  %v1255_v1 = vpop.f32.mrb[77].mxu0  ;;  %v1498_v46 = vpop.f32.mrb[77].mxu1 }
 0x30b   : > { %v1256_v45 = vadd.f32 %v1255_v1, %v4663_v31  ;;  %v1499_v57 = vadd.f32 %v1498_v46, %v4665_v23  ;;  %v1257_v43 = vpop.f32.mrb[78].mxu0  ;;  %v1500_v30 = vpop.f32.mrb[78].mxu1 }
 0x30c   : > { %v1258_v51 = vadd.f32 %v1257_v43, %v4659_v33  ;;  %v1501_v12 = vadd.f32 %v1500_v30, %v4661_v29  ;;  %v1259_v41 = vpop.f32.mrb[79].mxu0  ;;  %v1502_v14 = vpop.f32.mrb[79].mxu1  ;;  %v1667_v5 = vmax.f32 %v1254_v21, 0.0  ;;  %v1669_v58 = vmax.f32 %v1497_v63, 0.0 }
 0x30d   : > { %v1260_v37 = vadd.f32 %v1259_v41, %v4663_v31  ;;  %v1503_v53 = vadd.f32 %v1502_v14, %v4665_v23  ;;  %v1668_v18 = vmax.f32 %v1256_v45, 0.0  ;;  %v1670_v19 = vmax.f32 %v1499_v57, 0.0 }
 0x30e   : > { %2191 = vmatmul.mubr.bf16.gmra.mrb[148].mxu1 %v4967_v3  ;;  %2392 = vmatmul.mubr.bf16.gmra.mrb[148].mxu0 %v4969_v9  ;;  %v1671_v54 = vmax.f32 %v1258_v51, 0.0  ;;  %v1673_v44 = vmax.f32 %v1501_v12, 0.0 }
 0x30f   : > { %2198 = vmatprep.mubr.bf16.mxu1 %v1752_v10  ;;  %2399 = vmatprep.mubr.bf16.mxu0 %v1754_v42  ;;  %v1672_v32 = vmax.f32 %v1260_v37, 0.0  ;;  %v1674_v59 = vmax.f32 %v1503_v53, 0.0 }
 0x310   : > { %v1759_v0 = vpack.c.bf16 %v1671_v54, %v1667_v5  ;;  %v1761_v49 = vpack.c.bf16 %v1673_v44, %v1669_v58 }
 0x311   : > { %v1760_v39 = vpack.c.bf16 %v1672_v32, %v1668_v18  ;;  %v1762_v3 = vpack.c.bf16 %v1674_v59, %v1670_v19 }
 0x316   : > { %2199 = vmatmul.mubr.bf16.gmra.mrb[152].mxu1 %v4981_v11  ;;  %2400 = vmatmul.mubr.bf16.gmra.mrb[152].mxu0 %v4983_v22 }
 0x317   : > { %2206 = vmatprep.mubr.bf16.mxu1 %v1756_v8  ;;  %2407 = vmatprep.mubr.bf16.mxu0 %v1758_v28 }
 0x31e   : > { %2207 = vmatmul.mubr.bf16.gmra.mrb[156].mxu1 %v1755_v50  ;;  %2408 = vmatmul.mubr.bf16.gmra.mrb[156].mxu0 %v1757_v20 }
 0x31f   : > { %2214 = vmatprep.mubr.bf16.mxu1 %v1760_v39  ;;  %2415 = vmatprep.mubr.bf16.mxu0 %v1762_v3 }
 0x326   : > { %2215 = vmatmul.mubr.bf16.gmra.mrb[160].mxu1 %v1759_v0  ;;  %2416 = vmatmul.mubr.bf16.gmra.mrb[160].mxu0 %v1761_v49 }
 0x359   : > { %v1263_v9 = vpop.f32.mrb[80].mxu0  ;;  %v1506_v10 = vpop.f32.mrb[80].mxu1 }
 0x35a   : > { %v1264_v42 = vadd.f32 %v1263_v9, %v4659_v33  ;;  %v1507_v34 = vadd.f32 %v1506_v10, %v4661_v29  ;;  %v1265_v47 = vpop.f32.mrb[81].mxu0  ;;  %v1508_v27 = vpop.f32.mrb[81].mxu1 }
 0x35b   : > { %v1266_v11 = vadd.f32 %v1265_v47, %v4663_v31  ;;  %v1509_v22 = vadd.f32 %v1508_v27, %v4665_v23  ;;  %v1267_v40 = vpop.f32.mrb[82].mxu0  ;;  %v1510_v48 = vpop.f32.mrb[82].mxu1 }
 0x35c   : > { %v1268_v55 = vadd.f32 %v1267_v40, %v4659_v33  ;;  %v1511_v17 = vadd.f32 %v1510_v48, %v4661_v29  ;;  %v1269_v2 = vpop.f32.mrb[83].mxu0  ;;  %v1512_v61 = vpop.f32.mrb[83].mxu1  ;;  %v1675_v16 = vmax.f32 %v1264_v42, 0.0  ;;  %v1677_v6 = vmax.f32 %v1507_v34, 0.0  ;;  %v5018_v33 = vld [vmem:[%s5240_s4] ss:$0 sm:$0xff] }
 0x35d   : > { %v1270_v38 = vadd.f32 %v1269_v2, %v4663_v31  ;;  %v1513_v35 = vadd.f32 %v1512_v61, %v4665_v23  ;;  %v1676_v13 = vmax.f32 %v1266_v11, 0.0  ;;  %v1678_v25 = vmax.f32 %v1509_v22, 0.0 }
 0x35e   : > { %v1679_v15 = vmax.f32 %v1268_v55, 0.0  ;;  %v1681_v62 = vmax.f32 %v1511_v17, 0.0 }
 0x35f   : > { %v1680_v24 = vmax.f32 %v1270_v38, 0.0  ;;  %v1682_v4 = vmax.f32 %v1513_v35, 0.0 }
 0x360   : > { %v1763_v29 = vpack.c.bf16 %v1679_v15, %v1675_v16  ;;  %v1765_v36 = vpack.c.bf16 %v1681_v62, %v1677_v6 }
 0x361   : > { %v1764_v56 = vpack.c.bf16 %v1680_v24, %v1676_v13  ;;  %v1766_v31 = vpack.c.bf16 %v1682_v4, %v1678_v25  ;;  %v2064_v52 = vpop.f32.mrb[84].mxu1  ;;  %v2265_v23 = vpop.f32.mrb[84].mxu0 }
 0x362   : > { %v2065_v26 = vadd.f32 %v5018_v33, %v2064_v52  ;;  %v2066_v50 = vpop.f32.mrb[85].mxu1  ;;  %v2267_v20 = vpop.f32.mrb[85].mxu0 }
 0x363   : > { %v2067_v8 = vpop.f32.mrb[86].mxu1  ;;  %2222 = vmatprep.mubr.bf16.mxu1 %v1764_v56  ;;  %v2268_v28 = vpop.f32.mrb[86].mxu0  ;;  %2423 = vmatprep.mubr.bf16.mxu0 %v1766_v31 }
 0x364   : > { %v2266_v7 = vadd.f32 %v2265_v23, %v2065_v26  ;;  %v2068_v60 = vadd.f32 %v5018_v33, %v2067_v8  ;;  %v2069_v21 = vpop.f32.mrb[87].mxu1  ;;  %2223 = vmatmul.mubr.bf16.gmra.mrb[164].mxu1 %v1763_v29  ;;  %v2270_v63 = vpop.f32.mrb[87].mxu0  ;;  %2424 = vmatmul.mubr.bf16.gmra.mrb[164].mxu0 %v1765_v36 }
 0x366   : > { %v2269_v1 = vadd.f32 %v2268_v28, %v2068_v60 }
 0x368   : > { %v3276_v46 = vpack.c.bf16 %v2269_v1, %v2266_v7 }
 0x369   : > { %v2072_v45 = vpop.f32.mrb[88].mxu1  ;;  %v2273_v57 = vpop.f32.mrb[88].mxu0 }
 0x36a   : > { %3277 = vst [vmem:[%s5023_s18] sm:$0xff] %v3276_v46   ;;  %v2073_v43 = vadd.f32 %v5018_v33, %v2072_v45  ;;  %v2074_v30 = vpop.f32.mrb[89].mxu1  ;;  %v2275_v51 = vpop.f32.mrb[89].mxu0 }
 0x36b   : > { %v2075_v12 = vpop.f32.mrb[90].mxu1  ;;  %v2276_v41 = vpop.f32.mrb[90].mxu0 }
 0x36c   : > { %v2274_v14 = vadd.f32 %v2273_v57, %v2073_v43  ;;  %v2076_v37 = vadd.f32 %v5018_v33, %v2075_v12  ;;  %v2077_v53 = vpop.f32.mrb[91].mxu1  ;;  %v2278_v5 = vpop.f32.mrb[91].mxu0 }
 0x36e   : > { %v2277_v58 = vadd.f32 %v2276_v41, %v2076_v37 }
 0x370   : > { %v3281_v54 = vpack.c.bf16 %v2277_v58, %v2274_v14 }
 0x371   : > { %v2080_v44 = vpop.f32.mrb[92].mxu1  ;;  %v2281_v18 = vpop.f32.mrb[92].mxu0 }
 0x372   : > { %3398 = vst [vmem:[%s5023_s18 + $0x8] sm:$0xff] %v3281_v54   ;;  %v2081_v19 = vadd.f32 %v5018_v33, %v2080_v44  ;;  %v2082_v32 = vpop.f32.mrb[93].mxu1  ;;  %v2283_v59 = vpop.f32.mrb[93].mxu0 }
 0x373   : > { %v2083_v0 = vpop.f32.mrb[94].mxu1  ;;  %v2284_v49 = vpop.f32.mrb[94].mxu0 }
 0x374   : > { %v2282_v39 = vadd.f32 %v2281_v18, %v2081_v19  ;;  %v2084_v3 = vadd.f32 %v5018_v33, %v2083_v0  ;;  %v2085_v9 = vpop.f32.mrb[95].mxu1  ;;  %v2286_v10 = vpop.f32.mrb[95].mxu0 }
 0x376   : > { %v2285_v42 = vadd.f32 %v2284_v49, %v2084_v3 }
 0x378   : > { %v3286_v34 = vpack.c.bf16 %v2285_v42, %v2282_v39 }
 0x379   : > { %v2088_v47 = vpop.f32.mrb[96].mxu1  ;;  %v2289_v27 = vpop.f32.mrb[96].mxu0 }
 0x37a   : > { %3399 = vst [vmem:[%s5023_s18 + $0x10] sm:$0xff] %v3286_v34   ;;  %v2089_v11 = vadd.f32 %v5018_v33, %v2088_v47  ;;  %v2090_v22 = vpop.f32.mrb[97].mxu1  ;;  %v2291_v40 = vpop.f32.mrb[97].mxu0 }
 0x37b   : > { %v2091_v48 = vpop.f32.mrb[98].mxu1  ;;  %v2292_v55 = vpop.f32.mrb[98].mxu0 }
 0x37c   : > { %v2290_v17 = vadd.f32 %v2289_v27, %v2089_v11  ;;  %v2092_v2 = vadd.f32 %v5018_v33, %v2091_v48  ;;  %v2093_v61 = vpop.f32.mrb[99].mxu1  ;;  %v2294_v38 = vpop.f32.mrb[99].mxu0 }
 0x37e   : > { %v2293_v35 = vadd.f32 %v2292_v55, %v2092_v2 }
 0x380   : > { %v3291_v16 = vpack.c.bf16 %v2293_v35, %v2290_v17 }
 0x381   : > { %v2096_v6 = vpop.f32.mrb[100].mxu1  ;;  %v2297_v15 = vpop.f32.mrb[100].mxu0 }
 0x382   : > { %3400 = vst [vmem:[%s5023_s18 + $0x18] sm:$0xff] %v3291_v16   ;;  %v2097_v62 = vadd.f32 %v5018_v33, %v2096_v6  ;;  %v2098_v13 = vpop.f32.mrb[101].mxu1  ;;  %v2299_v25 = vpop.f32.mrb[101].mxu0 }
 0x383   : > { %v2099_v24 = vpop.f32.mrb[102].mxu1  ;;  %v2300_v4 = vpop.f32.mrb[102].mxu0 }
 0x384   : > { %v2298_v29 = vadd.f32 %v2297_v15, %v2097_v62  ;;  %v2100_v36 = vadd.f32 %v5018_v33, %v2099_v24  ;;  %v2101_v56 = vpop.f32.mrb[103].mxu1  ;;  %v2302_v31 = vpop.f32.mrb[103].mxu0 }
 0x386   : > { %v2301_v52 = vadd.f32 %v2300_v4, %v2100_v36 }
 0x388   : > { %v3296_v23 = vpack.c.bf16 %v2301_v52, %v2298_v29 }
 0x389   : > { %v2104_v26 = vpop.f32.mrb[104].mxu1  ;;  %v2305_v50 = vpop.f32.mrb[104].mxu0 }
 0x38a   : > { %3401 = vst [vmem:[%s5023_s18 + $0x20] sm:$0xff] %v3296_v23   ;;  %v2105_v20 = vadd.f32 %v5018_v33, %v2104_v26  ;;  %v2106_v8 = vpop.f32.mrb[105].mxu1  ;;  %v2307_v28 = vpop.f32.mrb[105].mxu0 }
 0x38b   : > { %v2107_v7 = vpop.f32.mrb[106].mxu1  ;;  %v2308_v60 = vpop.f32.mrb[106].mxu0 }
 0x38c   : > { %v2306_v21 = vadd.f32 %v2305_v50, %v2105_v20  ;;  %v2108_v63 = vadd.f32 %v5018_v33, %v2107_v7  ;;  %v2109_v1 = vpop.f32.mrb[107].mxu1  ;;  %v2310_v46 = vpop.f32.mrb[107].mxu0 }
 0x38e   : > { %v2309_v45 = vadd.f32 %v2308_v60, %v2108_v63 }
 0x390   : > { %v3301_v57 = vpack.c.bf16 %v2309_v45, %v2306_v21 }
 0x391   : > { %v2112_v43 = vpop.f32.mrb[108].mxu1  ;;  %v2313_v30 = vpop.f32.mrb[108].mxu0 }
 0x392   : > { %3402 = vst [vmem:[%s5023_s18 + $0x28] sm:$0xff] %v3301_v57   ;;  %v2113_v51 = vadd.f32 %v5018_v33, %v2112_v43  ;;  %v2114_v12 = vpop.f32.mrb[109].mxu1  ;;  %v2315_v41 = vpop.f32.mrb[109].mxu0 }
 0x393   : > { %v2115_v14 = vpop.f32.mrb[110].mxu1  ;;  %v2316_v37 = vpop.f32.mrb[110].mxu0 }
 0x394   : > { %v2314_v53 = vadd.f32 %v2313_v30, %v2113_v51  ;;  %v2116_v5 = vadd.f32 %v5018_v33, %v2115_v14  ;;  %v2117_v58 = vpop.f32.mrb[111].mxu1  ;;  %v2318_v54 = vpop.f32.mrb[111].mxu0 }
 0x396   : > { %v2317_v44 = vadd.f32 %v2316_v37, %v2116_v5 }
 0x398   : > { %v3306_v18 = vpack.c.bf16 %v2317_v44, %v2314_v53 }
 0x399   : > { %v2120_v19 = vpop.f32.mrb[112].mxu1  ;;  %v2321_v32 = vpop.f32.mrb[112].mxu0 }
 0x39a   : > { %3403 = vst [vmem:[%s5023_s18 + $0x30] sm:$0xff] %v3306_v18   ;;  %v2121_v59 = vadd.f32 %v5018_v33, %v2120_v19  ;;  %v2122_v0 = vpop.f32.mrb[113].mxu1  ;;  %v2323_v49 = vpop.f32.mrb[113].mxu0 }
 0x39b   : > { %v2123_v39 = vpop.f32.mrb[114].mxu1  ;;  %v2324_v3 = vpop.f32.mrb[114].mxu0 }
 0x39c   : > { %v2322_v9 = vadd.f32 %v2321_v32, %v2121_v59  ;;  %v2124_v10 = vadd.f32 %v5018_v33, %v2123_v39  ;;  %v2125_v42 = vpop.f32.mrb[115].mxu1  ;;  %v2326_v34 = vpop.f32.mrb[115].mxu0 }
 0x39e   : > { %v2325_v47 = vadd.f32 %v2324_v3, %v2124_v10 }
 0x3a0   : > { %v3311_v27 = vpack.c.bf16 %v2325_v47, %v2322_v9 }
 0x3a1   : > { %v2128_v11 = vpop.f32.mrb[116].mxu1  ;;  %v2329_v22 = vpop.f32.mrb[116].mxu0 }
 0x3a2   : > { %3404 = vst [vmem:[%s5023_s18 + $0x38] sm:$0xff] %v3311_v27   ;;  %v2129_v40 = vadd.f32 %v5018_v33, %v2128_v11  ;;  %v2130_v48 = vpop.f32.mrb[117].mxu1  ;;  %v2331_v55 = vpop.f32.mrb[117].mxu0 }
 0x3a3   : > { %v2131_v17 = vpop.f32.mrb[118].mxu1  ;;  %v2332_v2 = vpop.f32.mrb[118].mxu0 }
 0x3a4   : > { %v2330_v61 = vadd.f32 %v2329_v22, %v2129_v40  ;;  %v2132_v38 = vadd.f32 %v5018_v33, %v2131_v17  ;;  %v2133_v35 = vpop.f32.mrb[119].mxu1  ;;  %v2334_v16 = vpop.f32.mrb[119].mxu0 }
 0x3a6   : > { %v2333_v6 = vadd.f32 %v2332_v2, %v2132_v38 }
 0x3a8   : > { %v3316_v15 = vpack.c.bf16 %v2333_v6, %v2330_v61 }
 0x3a9   : > { %v2136_v62 = vpop.f32.mrb[120].mxu1  ;;  %v2337_v13 = vpop.f32.mrb[120].mxu0 }
 0x3aa   : > { %3405 = vst [vmem:[%s5023_s18 + $0x40] sm:$0xff] %v3316_v15   ;;  %v2137_v25 = vadd.f32 %v5018_v33, %v2136_v62  ;;  %v2138_v24 = vpop.f32.mrb[121].mxu1  ;;  %v2339_v4 = vpop.f32.mrb[121].mxu0 }
 0x3ab   : > { %v2139_v29 = vpop.f32.mrb[122].mxu1  ;;  %v2340_v36 = vpop.f32.mrb[122].mxu0 }
 0x3ac   : > { %v2338_v56 = vadd.f32 %v2337_v13, %v2137_v25  ;;  %v2140_v31 = vadd.f32 %v5018_v33, %v2139_v29  ;;  %v2141_v52 = vpop.f32.mrb[123].mxu1  ;;  %v2342_v23 = vpop.f32.mrb[123].mxu0 }
 0x3ae   : > { %v2341_v26 = vadd.f32 %v2340_v36, %v2140_v31 }
 0x3b0   : > { %v3321_v50 = vpack.c.bf16 %v2341_v26, %v2338_v56 }
 0x3b1   : > { %v2144_v20 = vpop.f32.mrb[124].mxu1  ;;  %v2345_v8 = vpop.f32.mrb[124].mxu0 }
 0x3b2   : > { %3406 = vst [vmem:[%s5023_s18 + $0x48] sm:$0xff] %v3321_v50   ;;  %v2145_v28 = vadd.f32 %v5018_v33, %v2144_v20  ;;  %v2146_v7 = vpop.f32.mrb[125].mxu1  ;;  %v2347_v60 = vpop.f32.mrb[125].mxu0 }
 0x3b3   : > { %v2147_v21 = vpop.f32.mrb[126].mxu1  ;;  %v2348_v63 = vpop.f32.mrb[126].mxu0 }
 0x3b4   : > { %v2346_v1 = vadd.f32 %v2345_v8, %v2145_v28  ;;  %v2148_v46 = vadd.f32 %v5018_v33, %v2147_v21  ;;  %v2149_v45 = vpop.f32.mrb[127].mxu1  ;;  %v2350_v57 = vpop.f32.mrb[127].mxu0 }
 0x3b6   : > { %v2349_v43 = vadd.f32 %v2348_v63, %v2148_v46 }
 0x3b8   : > { %v3326_v30 = vpack.c.bf16 %v2349_v43, %v2346_v1 }
 0x3b9   : > { %v2152_v51 = vpop.f32.mrb[128].mxu1  ;;  %v2353_v12 = vpop.f32.mrb[128].mxu0 }
 0x3ba   : > { %3407 = vst [vmem:[%s5023_s18 + $0x50] sm:$0xff] %v3326_v30   ;;  %v2153_v41 = vadd.f32 %v5018_v33, %v2152_v51  ;;  %v2154_v14 = vpop.f32.mrb[129].mxu1  ;;  %v2355_v37 = vpop.f32.mrb[129].mxu0 }
 0x3bb   : > { %v2155_v53 = vpop.f32.mrb[130].mxu1  ;;  %v2356_v5 = vpop.f32.mrb[130].mxu0 }
 0x3bc   : > { %v2354_v58 = vadd.f32 %v2353_v12, %v2153_v41  ;;  %v2156_v54 = vadd.f32 %v5018_v33, %v2155_v53  ;;  %v2157_v44 = vpop.f32.mrb[131].mxu1  ;;  %v2358_v18 = vpop.f32.mrb[131].mxu0 }
 0x3be   : > { %v2357_v19 = vadd.f32 %v2356_v5, %v2156_v54 }
 0x3c0   : > { %v3331_v32 = vpack.c.bf16 %v2357_v19, %v2354_v58 }
 0x3c1   : > { %v2160_v59 = vpop.f32.mrb[132].mxu1  ;;  %v2361_v0 = vpop.f32.mrb[132].mxu0 }
 0x3c2   : > { %3408 = vst [vmem:[%s5023_s18 + $0x58] sm:$0xff] %v3331_v32   ;;  %v2161_v49 = vadd.f32 %v5018_v33, %v2160_v59  ;;  %v2162_v39 = vpop.f32.mrb[133].mxu1  ;;  %v2363_v3 = vpop.f32.mrb[133].mxu0 }
 0x3c3   : > { %v2163_v9 = vpop.f32.mrb[134].mxu1  ;;  %v2364_v10 = vpop.f32.mrb[134].mxu0 }
 0x3c4   : > { %v2362_v42 = vadd.f32 %v2361_v0, %v2161_v49  ;;  %v2164_v34 = vadd.f32 %v5018_v33, %v2163_v9  ;;  %v2165_v47 = vpop.f32.mrb[135].mxu1  ;;  %v2366_v27 = vpop.f32.mrb[135].mxu0 }
 0x3c6   : > { %v2365_v11 = vadd.f32 %v2364_v10, %v2164_v34 }
 0x3c8   : > { %v3336_v22 = vpack.c.bf16 %v2365_v11, %v2362_v42 }
 0x3c9   : > { %v2168_v40 = vpop.f32.mrb[136].mxu1  ;;  %v2369_v48 = vpop.f32.mrb[136].mxu0 }
 0x3ca   : > { %3409 = vst [vmem:[%s5023_s18 + $0x60] sm:$0xff] %v3336_v22   ;;  %v2169_v55 = vadd.f32 %v5018_v33, %v2168_v40  ;;  %v2170_v17 = vpop.f32.mrb[137].mxu1  ;;  %v2371_v2 = vpop.f32.mrb[137].mxu0 }
 0x3cb   : > { %v2171_v61 = vpop.f32.mrb[138].mxu1  ;;  %v2372_v38 = vpop.f32.mrb[138].mxu0 }
 0x3cc   : > { %v2370_v35 = vadd.f32 %v2369_v48, %v2169_v55  ;;  %v2172_v16 = vadd.f32 %v5018_v33, %v2171_v61  ;;  %v2173_v6 = vpop.f32.mrb[139].mxu1  ;;  %v2374_v15 = vpop.f32.mrb[139].mxu0 }
 0x3ce   : > { %v2373_v62 = vadd.f32 %v2372_v38, %v2172_v16 }
 0x3d0   : > { %v3341_v13 = vpack.c.bf16 %v2373_v62, %v2370_v35 }
 0x3d1   : > { %v2176_v25 = vpop.f32.mrb[140].mxu1  ;;  %v2377_v24 = vpop.f32.mrb[140].mxu0 }
 0x3d2   : > { %3410 = vst [vmem:[%s5023_s18 + $0x68] sm:$0xff] %v3341_v13   ;;  %v2177_v4 = vadd.f32 %v5018_v33, %v2176_v25  ;;  %v2178_v29 = vpop.f32.mrb[141].mxu1  ;;  %v2379_v36 = vpop.f32.mrb[141].mxu0 }
 0x3d3   : > { %v2179_v56 = vpop.f32.mrb[142].mxu1  ;;  %v2380_v31 = vpop.f32.mrb[142].mxu0 }
 0x3d4   : > { %v2378_v52 = vadd.f32 %v2377_v24, %v2177_v4  ;;  %v2180_v23 = vadd.f32 %v5018_v33, %v2179_v56  ;;  %v2181_v26 = vpop.f32.mrb[143].mxu1  ;;  %v2382_v50 = vpop.f32.mrb[143].mxu0 }
 0x3d6   : > { %v2381_v20 = vadd.f32 %v2380_v31, %v2180_v23 }
 0x3d8   : > { %v3346_v8 = vpack.c.bf16 %v2381_v20, %v2378_v52 }
 0x3d9   : > { %v2184_v28 = vpop.f32.mrb[144].mxu1  ;;  %v2385_v7 = vpop.f32.mrb[144].mxu0 }
 0x3da   : > { %3411 = vst [vmem:[%s5023_s18 + $0x70] sm:$0xff] %v3346_v8   ;;  %v2185_v60 = vadd.f32 %v5018_v33, %v2184_v28  ;;  %v2186_v21 = vpop.f32.mrb[145].mxu1  ;;  %v2387_v63 = vpop.f32.mrb[145].mxu0 }
 0x3db   : > { %v2187_v1 = vpop.f32.mrb[146].mxu1  ;;  %v2388_v46 = vpop.f32.mrb[146].mxu0 }
 0x3dc   : > { %v2386_v45 = vadd.f32 %v2385_v7, %v2185_v60  ;;  %v2188_v57 = vadd.f32 %v5018_v33, %v2187_v1  ;;  %v2189_v43 = vpop.f32.mrb[147].mxu1  ;;  %v2390_v30 = vpop.f32.mrb[147].mxu0 }
 0x3de   : > { %v2389_v51 = vadd.f32 %v2388_v46, %v2188_v57 }
 0x3e0   : > { %v3351_v12 = vpack.c.bf16 %v2389_v51, %v2386_v45 }
 0x3e1   : > { %v2192_v41 = vpop.f32.mrb[148].mxu1  ;;  %v2393_v14 = vpop.f32.mrb[148].mxu0 }
 0x3e2   : > { %3412 = vst [vmem:[%s5023_s18 + $0x78] sm:$0xff] %v3351_v12   ;;  %v2193_v37 = vadd.f32 %v5018_v33, %v2192_v41  ;;  %v2194_v53 = vpop.f32.mrb[149].mxu1  ;;  %v2395_v5 = vpop.f32.mrb[149].mxu0 }
 0x3e3   : > { %v2195_v58 = vpop.f32.mrb[150].mxu1  ;;  %v2396_v54 = vpop.f32.mrb[150].mxu0 }
 0x3e4   : > { %v2394_v44 = vadd.f32 %v2393_v14, %v2193_v37  ;;  %v2196_v18 = vadd.f32 %v5018_v33, %v2195_v58  ;;  %v2197_v19 = vpop.f32.mrb[151].mxu1  ;;  %v2398_v32 = vpop.f32.mrb[151].mxu0 }
 0x3e6   : > { %v2397_v59 = vadd.f32 %v2396_v54, %v2196_v18 }
 0x3e8   : > { %v3356_v0 = vpack.c.bf16 %v2397_v59, %v2394_v44 }
 0x3e9   : > { %v2200_v49 = vpop.f32.mrb[152].mxu1  ;;  %v2401_v39 = vpop.f32.mrb[152].mxu0 }
 0x3ea   : > { %3413 = vst [vmem:[%s5023_s18 + $0x80] sm:$0xff] %v3356_v0   ;;  %v2201_v3 = vadd.f32 %v5018_v33, %v2200_v49  ;;  %v2202_v9 = vpop.f32.mrb[153].mxu1  ;;  %v2403_v10 = vpop.f32.mrb[153].mxu0 }
 0x3eb   : > { %v2203_v42 = vpop.f32.mrb[154].mxu1  ;;  %v2404_v34 = vpop.f32.mrb[154].mxu0 }
 0x3ec   : > { %v2402_v47 = vadd.f32 %v2401_v39, %v2201_v3  ;;  %v2204_v27 = vadd.f32 %v5018_v33, %v2203_v42  ;;  %v2205_v11 = vpop.f32.mrb[155].mxu1  ;;  %v2406_v22 = vpop.f32.mrb[155].mxu0 }
 0x3ee   : > { %v2405_v40 = vadd.f32 %v2404_v34, %v2204_v27 }
 0x3f0   : > { %v3361_v48 = vpack.c.bf16 %v2405_v40, %v2402_v47 }
 0x3f1   : > { %v2208_v55 = vpop.f32.mrb[156].mxu1  ;;  %v2409_v17 = vpop.f32.mrb[156].mxu0 }
 0x3f2   : > { %3414 = vst [vmem:[%s5023_s18 + $0x88] sm:$0xff] %v3361_v48   ;;  %v2209_v2 = vadd.f32 %v5018_v33, %v2208_v55  ;;  %v2210_v61 = vpop.f32.mrb[157].mxu1  ;;  %v2411_v38 = vpop.f32.mrb[157].mxu0 }
 0x3f3   : > { %v2211_v35 = vpop.f32.mrb[158].mxu1  ;;  %v2412_v16 = vpop.f32.mrb[158].mxu0 }
 0x3f4   : > { %v2410_v6 = vadd.f32 %v2409_v17, %v2209_v2  ;;  %v2212_v15 = vadd.f32 %v5018_v33, %v2211_v35  ;;  %v2213_v62 = vpop.f32.mrb[159].mxu1  ;;  %v2414_v13 = vpop.f32.mrb[159].mxu0 }
 0x3f6   : > { %v2413_v25 = vadd.f32 %v2412_v16, %v2212_v15 }
 0x3f8   : > { %v3366_v24 = vpack.c.bf16 %v2413_v25, %v2410_v6 }
 0x3f9   : > { %v2216_v4 = vpop.f32.mrb[160].mxu1  ;;  %v2417_v29 = vpop.f32.mrb[160].mxu0 }
 0x3fa   : > { %3415 = vst [vmem:[%s5023_s18 + $0x90] sm:$0xff] %v3366_v24   ;;  %v2217_v36 = vadd.f32 %v5018_v33, %v2216_v4  ;;  %v2218_v56 = vpop.f32.mrb[161].mxu1  ;;  %v2419_v31 = vpop.f32.mrb[161].mxu0 }
 0x3fb   : > { %v2219_v52 = vpop.f32.mrb[162].mxu1  ;;  %v2420_v23 = vpop.f32.mrb[162].mxu0 }
 0x3fc   : > { %v2418_v26 = vadd.f32 %v2417_v29, %v2217_v36  ;;  %v2220_v50 = vadd.f32 %v5018_v33, %v2219_v52  ;;  %v2221_v20 = vpop.f32.mrb[163].mxu1  ;;  %v2422_v8 = vpop.f32.mrb[163].mxu0 }
 0x3fe   : > { %v2421_v28 = vadd.f32 %v2420_v23, %v2220_v50 }
 0x400   : > { %v3371_v7 = vpack.c.bf16 %v2421_v28, %v2418_v26 }
 0x402   : > { %3416 = vst [vmem:[%s5023_s18 + $0x98] sm:$0xff] %v3371_v7  }
 0x437   : > { %v2224_v60 = vpop.f32.mrb[164].mxu1  ;;  %v2425_v21 = vpop.f32.mrb[164].mxu0 }
 0x438   : > { %v2225_v63 = vadd.f32 %v5018_v33, %v2224_v60  ;;  %v2226_v1 = vpop.f32.mrb[165].mxu1  ;;  %v2427_v46 = vpop.f32.mrb[165].mxu0 }
 0x439   : > { %v2227_v45 = vpop.f32.mrb[166].mxu1  ;;  %v2428_v57 = vpop.f32.mrb[166].mxu0 }
 0x43a   : > { %v2426_v43 = vadd.f32 %v2425_v21, %v2225_v63  ;;  %v2228_v30 = vadd.f32 %v5018_v33, %v2227_v45  ;;  %v2229_v51 = vpop.f32.mrb[167].mxu1  ;;  %v2430_v12 = vpop.f32.mrb[167].mxu0  ;;  %2648 = sbr.rel (!%p3905_p4) target bundleno = 1178 (0x49a), region = 44 }
 0x43c   : > { %v2429_v41 = vadd.f32 %v2428_v57, %v2228_v30 }
 0x43e   : > { %v3376_v14 = vpack.c.bf16 %v2429_v41, %v2426_v43 }
 0x440   : > { %3417 = vst [vmem:[%s5023_s18 + $0xa0] sm:$0xff] %v3376_v14  }
 0x441   : > { %s5260_s23 = smov (!%p2651_p8, %s2650_s23), 42 }
 0x442   : > { %s3134_s30 = sshll.u32 %s5260_s23, 6 }
 0x443   : > { %p3137_p9 = scmp.eq.s32.totalorder %s3134_s30, 0 }
 0x444   : > { %3757 = sdivrem.u32 (!%p3137_p9), %s5260_s23, 42 }
 0x445   : > { %2659 = sbr.rel (%p3137_p9) target bundleno = 1178 (0x49a), region = 48 }
 0x44d   : > { %s5099_s26 = spop.drf %3757 }
 0x44e   : > { %p3138_p10 = scmp.le.s32.totalorder %s5099_s26, 0 }
 0x44f   : > { %s5253_s21 = smov (!%p3138_p10), %s5093_s29  ;;  %s5254_s27 = smov (!%p3138_p10), %s5023_s18 }
 0x450   : > { %2978 = sbr.rel (%p3138_p10) target bundleno = 1149 (0x47d), region = 120  ;;  %s5108_s6 = smov (!%p3138_p10), 0  }
 0x451   : > { %s5110_s8 = smov (!%p3138_p10), 0  }
 0x457 LB: >> { %v2676_v33 = vld [vmem:[%s3823_s27] sm:$0xf]  ;;  %v2678_v37 = vld [vmem:[%s3823_s27 + $0x4] sm:$0xf]  ;;  %v2680_v53 = vld [vmem:[%s3823_s27 + $0x8] sm:$0xf]  ;;  %s3831_s8 = sphi %s5110_s8, %s2670_s8   ;;  %s3827_s6 = sphi %s5108_s6, %s5255_s6   ;;  %s3823_s27 = sphi %s5254_s27, %s2765_s27   ;;  %s3819_s21 = sphi %s5253_s21, %s2766_s21  }
 0x458   : >> { %2677 = vst [vmem:[%s3819_s21] sm:$0xf] %v2676_v33  ;;  %2679 = vst [vmem:[%s3819_s21 + $0x4] sm:$0xf] %v2678_v37  ;;  %v2682_v5 = vld [vmem:[%s3823_s27 + $0xc] sm:$0xf]  ;;  %s2760_s9 = sadd.s32 1, %s3827_s6 }
 0x459   : >> { %2681 = vst [vmem:[%s3819_s21 + $0x8] sm:$0xf] %v2680_v53  ;;  %v2684_v58 = vld [vmem:[%s3823_s27 + $0x10] sm:$0xf]  ;;  %v2686_v54 = vld [vmem:[%s3823_s27 + $0x14] sm:$0xf]  ;;  %p2761_p11 = scmp.ge.s32.totalorder %s2760_s9, %s5099_s26 }
 0x45a   : >> { %2683 = vst [vmem:[%s3819_s21 + $0xc] sm:$0xf] %v2682_v5  ;;  %2685 = vst [vmem:[%s3819_s21 + $0x10] sm:$0xf] %v2684_v58  ;;  %v2688_v44 = vld [vmem:[%s3823_s27 + $0x18] sm:$0xf] }
 0x45b   : >> { %2687 = vst [vmem:[%s3819_s21 + $0x14] sm:$0xf] %v2686_v54  ;;  %v2690_v18 = vld [vmem:[%s3823_s27 + $0x1c] sm:$0xf]  ;;  %v2692_v19 = vld [vmem:[%s3823_s27 + $0x20] sm:$0xf] }
 0x45c   : >> { %2689 = vst [vmem:[%s3819_s21 + $0x18] sm:$0xf] %v2688_v44  ;;  %2691 = vst [vmem:[%s3819_s21 + $0x1c] sm:$0xf] %v2690_v18  ;;  %v2694_v32 = vld [vmem:[%s3823_s27 + $0x24] sm:$0xf] }
 0x45d   : >> { %2693 = vst [vmem:[%s3819_s21 + $0x20] sm:$0xf] %v2692_v19  ;;  %v2696_v59 = vld [vmem:[%s3823_s27 + $0x28] sm:$0xf]  ;;  %v2698_v0 = vld [vmem:[%s3823_s27 + $0x2c] sm:$0xf] }
 0x45e   : >> { %2695 = vst [vmem:[%s3819_s21 + $0x24] sm:$0xf] %v2694_v32  ;;  %2697 = vst [vmem:[%s3819_s21 + $0x28] sm:$0xf] %v2696_v59  ;;  %v2700_v49 = vld [vmem:[%s3823_s27 + $0x30] sm:$0xf] }
 0x45f   : >> { %2699 = vst [vmem:[%s3819_s21 + $0x2c] sm:$0xf] %v2698_v0  ;;  %v2702_v39 = vld [vmem:[%s3823_s27 + $0x34] sm:$0xf]  ;;  %v2704_v3 = vld [vmem:[%s3823_s27 + $0x38] sm:$0xf] }
 0x460   : >> { %2701 = vst [vmem:[%s3819_s21 + $0x30] sm:$0xf] %v2700_v49  ;;  %2703 = vst [vmem:[%s3819_s21 + $0x34] sm:$0xf] %v2702_v39  ;;  %v2706_v9 = vld [vmem:[%s3823_s27 + $0x3c] sm:$0xf] }
 0x461   : >> { %2705 = vst [vmem:[%s3819_s21 + $0x38] sm:$0xf] %v2704_v3  ;;  %v2708_v10 = vld [vmem:[%s3823_s27 + $0x40] sm:$0xf]  ;;  %v2710_v42 = vld [vmem:[%s3823_s27 + $0x44] sm:$0xf] }
 0x462   : >> { %2707 = vst [vmem:[%s3819_s21 + $0x3c] sm:$0xf] %v2706_v9  ;;  %2709 = vst [vmem:[%s3819_s21 + $0x40] sm:$0xf] %v2708_v10  ;;  %v2712_v34 = vld [vmem:[%s3823_s27 + $0x48] sm:$0xf] }
 0x463   : >> { %2711 = vst [vmem:[%s3819_s21 + $0x44] sm:$0xf] %v2710_v42  ;;  %v2714_v47 = vld [vmem:[%s3823_s27 + $0x4c] sm:$0xf]  ;;  %v2716_v27 = vld [vmem:[%s3823_s27 + $0x50] sm:$0xf] }
 0x464   : >> { %2713 = vst [vmem:[%s3819_s21 + $0x48] sm:$0xf] %v2712_v34  ;;  %2715 = vst [vmem:[%s3819_s21 + $0x4c] sm:$0xf] %v2714_v47  ;;  %v2718_v11 = vld [vmem:[%s3823_s27 + $0x54] sm:$0xf] }
 0x465   : >> { %2717 = vst [vmem:[%s3819_s21 + $0x50] sm:$0xf] %v2716_v27  ;;  %v2720_v22 = vld [vmem:[%s3823_s27 + $0x58] sm:$0xf]  ;;  %v2722_v40 = vld [vmem:[%s3823_s27 + $0x5c] sm:$0xf] }
 0x466   : >> { %2719 = vst [vmem:[%s3819_s21 + $0x54] sm:$0xf] %v2718_v11  ;;  %2721 = vst [vmem:[%s3819_s21 + $0x58] sm:$0xf] %v2720_v22  ;;  %v2724_v48 = vld [vmem:[%s3823_s27 + $0x60] sm:$0xf] }
 0x467   : >> { %2723 = vst [vmem:[%s3819_s21 + $0x5c] sm:$0xf] %v2722_v40  ;;  %v2726_v55 = vld [vmem:[%s3823_s27 + $0x64] sm:$0xf]  ;;  %v2728_v17 = vld [vmem:[%s3823_s27 + $0x68] sm:$0xf] }
 0x468   : >> { %2725 = vst [vmem:[%s3819_s21 + $0x60] sm:$0xf] %v2724_v48  ;;  %2727 = vst [vmem:[%s3819_s21 + $0x64] sm:$0xf] %v2726_v55  ;;  %v2730_v2 = vld [vmem:[%s3823_s27 + $0x6c] sm:$0xf] }
 0x469   : >> { %2729 = vst [vmem:[%s3819_s21 + $0x68] sm:$0xf] %v2728_v17  ;;  %v2732_v61 = vld [vmem:[%s3823_s27 + $0x70] sm:$0xf]  ;;  %v2734_v38 = vld [vmem:[%s3823_s27 + $0x74] sm:$0xf] }
 0x46a   : >> { %2731 = vst [vmem:[%s3819_s21 + $0x6c] sm:$0xf] %v2730_v2  ;;  %2733 = vst [vmem:[%s3819_s21 + $0x70] sm:$0xf] %v2732_v61  ;;  %v2736_v35 = vld [vmem:[%s3823_s27 + $0x78] sm:$0xf] }
 0x46b   : >> { %2735 = vst [vmem:[%s3819_s21 + $0x74] sm:$0xf] %v2734_v38  ;;  %v2738_v16 = vld [vmem:[%s3823_s27 + $0x7c] sm:$0xf]  ;;  %v2740_v6 = vld [vmem:[%s3823_s27 + $0x80] sm:$0xf] }
 0x46c   : >> { %2737 = vst [vmem:[%s3819_s21 + $0x78] sm:$0xf] %v2736_v35  ;;  %2739 = vst [vmem:[%s3819_s21 + $0x7c] sm:$0xf] %v2738_v16  ;;  %v2742_v15 = vld [vmem:[%s3823_s27 + $0x84] sm:$0xf] }
 0x46d   : >> { %2741 = vst [vmem:[%s3819_s21 + $0x80] sm:$0xf] %v2740_v6  ;;  %v2744_v62 = vld [vmem:[%s3823_s27 + $0x88] sm:$0xf]  ;;  %v2746_v13 = vld [vmem:[%s3823_s27 + $0x8c] sm:$0xf] }
 0x46e   : >> { %2743 = vst [vmem:[%s3819_s21 + $0x84] sm:$0xf] %v2742_v15  ;;  %2745 = vst [vmem:[%s3819_s21 + $0x88] sm:$0xf] %v2744_v62  ;;  %v2748_v25 = vld [vmem:[%s3823_s27 + $0x90] sm:$0xf] }
 0x46f   : >> { %2747 = vst [vmem:[%s3819_s21 + $0x8c] sm:$0xf] %v2746_v13  ;;  %v2750_v24 = vld [vmem:[%s3823_s27 + $0x94] sm:$0xf]  ;;  %v2752_v4 = vld [vmem:[%s3823_s27 + $0x98] sm:$0xf] }
 0x470   : >> { %2749 = vst [vmem:[%s3819_s21 + $0x90] sm:$0xf] %v2748_v25  ;;  %2751 = vst [vmem:[%s3819_s21 + $0x94] sm:$0xf] %v2750_v24  ;;  %v2754_v29 = vld [vmem:[%s3823_s27 + $0x9c] sm:$0xf] }
 0x471   : >> { %2753 = vst [vmem:[%s3819_s21 + $0x98] sm:$0xf] %v2752_v4  ;;  %v2756_v36 = vld [vmem:[%s3823_s27 + $0xa0] sm:$0xf]  ;;  %v2758_v56 = vld [vmem:[%s3823_s27 + $0xa4] sm:$0xf] }
 0x472   : >> { %2755 = vst [vmem:[%s3819_s21 + $0x9c] sm:$0xf] %v2754_v29  ;;  %2757 = vst [vmem:[%s3819_s21 + $0xa0] sm:$0xf] %v2756_v36  ;;  %s5262_s9 = smov (%p2761_p11, %s2760_s9), 0  ;;  %s2670_s8 = sadd.s32 1, %s3831_s8  }
 0x473   : >> { %2759 = vst [vmem:[%s3819_s21 + $0xa4] sm:$0xf] %v2758_v56  ;;  %s2763_s10 = smul.u32 168, %s5262_s9  ;;  %p2669_p12 = scmp.ge.s32.totalorder %s2670_s8, %s5099_s26 }
 0x474   : >> { %s5255_s6 = smov %s5262_s9 }
 0x475   : >> { %s2765_s27 = scalar_lea.vmem %s5023_s18, %s2763_s10 [#allocation2]   ;;  %s2766_s21 = scalar_lea.vmem %s5093_s29, %s2763_s10  }
 0x476   : > { %2672 = sbr.rel (!%p2669_p12) target bundleno = 1111 (0x457), region = 126 }
 0x47d PF: > { %3759 = sdivrem.u32 %s5260_s23, 42 }
 0x47e   : > { %s3139_s11 = smul.u32 168, %s5099_s26 }
 0x480   : > { %s2771_s12 = scalar_lea.vmem %s5023_s18, %s3139_s11 [#allocation2]   ;;  %s2773_s13 = scalar_lea.vmem %s5093_s29, %s3139_s11  }
 0x486   : > { %s3760_s14 = spop.drf %3759 }
 0x487   : > { %p3141_p13 = scmp.le.s32.totalorder %s3760_s14, 0 }
 0x488   : > { %s3833_s15 = smov (!%p3141_p13), %s2773_s13   ;;  %s3837_s16 = smov (!%p3141_p13), %s2771_s12  }
 0x489   : > { %2992 = sbr.rel (%p3141_p13) target bundleno = 1178 (0x49a), region = 131  ;;  %s3841_s17 = smov (!%p3141_p13), 0  }
 0x48a   : > { %s3845_s20 = smov (!%p3141_p13), 0  }
 0x490 LB: >> { %v2783_v31 = vld [vmem:[%s3839_s16] sm:$0xf]  ;;  %s2785_s24 = sadd.s32 1, %s3843_s17  ;;  %s2777_s20 = sadd.s32 1, %s3847_s20   ;;  %s3847_s20 = sphi %s3845_s20, %s2777_s20   ;;  %s3843_s17 = sphi %s3841_s17, %s3842_s17   ;;  %s3839_s16 = sphi %s3837_s16, %s2790_s16   ;;  %s3835_s15 = sphi %s3833_s15, %s2791_s15  }
 0x491   : >> { %2784 = vst [vmem:[%s3835_s15] sm:$0xf] %v2783_v31  ;;  %p2786_p0 = scmp.ge.s32.totalorder %s2785_s24, %s3760_s14  ;;  %p2776_p1 = scmp.ge.s32.totalorder %s2777_s20, %s3760_s14 }
 0x493   : >> { %s5264_s24 = smov (%p2786_p0, %s2785_s24), 0  ;;  %2779 = sbr.rel (!%p2776_p1) target bundleno = 1168 (0x490), region = 137 }
 0x494   : >> { %s3142_s18 = sshll.u32 %s5264_s24, 2  ;;  %s3842_s17 = smov %s5264_s24  }
 0x495   : >> { %s2790_s16 = scalar_lea.vmem %s2771_s12, %s3142_s18 [#allocation2]   ;;  %s2791_s15 = scalar_lea.vmem %s2773_s13, %s3142_s18  }
 0x49a PF: > { %p12_p2 = scmp.ge.s32.totalorder %s3895_s22, 4   ;;  %s5256_s18 = smov %s3811_s19 }
 0x49b   : > { %s5257_s19 = smov %s3903_s25  ;;  %s5258_s20 = smov %s3895_s22 }
 0x49c   :  { %14 = sbr.rel (!%p12_p2) target bundleno = 2 (0x2), region = 148 }

</bundles_post_ra>
